<compile_context>
chip_gen: v7x
topology: tpu7x:2x2x1
jax: 0.10.0
libtpu: 0.0.40
codegen_flags: <defaults>
</compile_context>

<pallas_src>
import functools

import jax
import jax.numpy as jnp
from jax.experimental import pallas as pl
from jax.experimental.pallas import tpu as pltpu

_LANE = 128
_COLS = 8 * _LANE           # lane-dense slab width (multiple of 128)
_SMALL_THRESHOLD = 65536    # below this, plain fused XLA elementwise wins


def _round_down(n: int, m: int) -> int:
    return (n // m) * m


def _round_up(n: int, m: int) -> int:
    return ((n + m - 1) // m) * m


def _sublane_count(dtype) -> int:
    """Packed sublane count: 8 for 4-byte, 16 for 2-byte, 32 for 1-byte dtypes."""
    itemsize = jnp.dtype(dtype).itemsize
    return {4: 8, 2: 16, 1: 32}.get(itemsize, 8)


def _int_pow(x, n: int):
    """x**n for a static non-negative int n via exponentiation by squaring (VPU-only)."""
    if n == 0:
        return jnp.ones_like(x)
    result = None
    base = x
    while n > 0:
        if n & 1:
            result = base if result is None else result * base
        n >>= 1
        if n:
            base = base * base
    return result


def _coeffs(exponent: float):
    p = float(exponent) + 1.0
    a = -(p + 1.0) * (p + 2.0) / 2.0
    b = p * (p + 2.0)
    c = -p * (p + 1.0) / 2.0
    p_minus_1 = p - 1.0
    int_exp = int(p_minus_1) if (p_minus_1 >= 0.0 and
                                 float(p_minus_1).is_integer()) else None
    return p_minus_1, a, b, c, int_exp


def _envelope_math(x_f32, *, p_minus_1, a, b, c, int_exp):
    """Shared f32 math: 1/x + x^(p-1) * (a + x*(b + c*x)) (Horner form)."""
    if int_exp is not None:
        x_pow = _int_pow(x_f32, int_exp)          # VPU-only repeated multiply
    else:
        x_pow = jnp.power(x_f32, p_minus_1)       # non-integral exponent fallback
    return 1.0 / x_f32 + x_pow * (a + x_f32 * (b + c * x_f32))


def _envelope_kernel(x_ref, o_ref, *, p_minus_1, a, b, c, int_exp):
    x = x_ref[...].astype(jnp.float32)
    y = _envelope_math(x, p_minus_1=p_minus_1, a=a, b=b, c=c, int_exp=int_exp)
    o_ref[...] = y.astype(o_ref.dtype)


def _envelope_jnp(x: jax.Array, exponent: float) -> jax.Array:
    """Plain-jnp path (tails / tiny inputs); same f32-compute semantics as kernel."""
    p_minus_1, a, b, c, int_exp = _coeffs(exponent)
    y = _envelope_math(x.astype(jnp.float32), p_minus_1=p_minus_1,
                       a=a, b=b, c=c, int_exp=int_exp)
    return y.astype(x.dtype)


def envelope(x: jax.Array, exponent: float, *,
             target_block_bytes: int = 4 * 1024 * 1024) -> jax.Array:
    """Pallas TPU implementation of Envelope.forward for arbitrary-shaped input."""
    orig_shape = x.shape
    dtype = x.dtype
    itemsize = jnp.dtype(dtype).itemsize

    flat = x.reshape(-1)                 # free (contiguous) reshape
    total = flat.shape[0]

    # Small-input fast path: fused XLA elementwise beats pallas_call overhead.
    if total < _SMALL_THRESHOLD:
        return _envelope_jnp(flat, exponent).reshape(orig_shape)

    p_minus_1, a, b, c, int_exp = _coeffs(exponent)
    kernel = functools.partial(_envelope_kernel, p_minus_1=p_minus_1,
                               a=a, b=b, c=c, int_exp=int_exp)

    cols = _COLS
    main = _round_down(total, cols)      # lane-aligned prefix for the kernel
    rows = main // cols

    sublane = _sublane_count(dtype)
    tile_m = max(sublane,
                 _round_down(target_block_bytes // (cols * itemsize), sublane))
    tile_m = min(tile_m, _round_up(rows, sublane))

    if main == total:
        x_main = flat.reshape(rows, cols)        # zero-copy reshape
    else:
        x_main = flat[:main].reshape(rows, cols)

    out_main = pl.pallas_call(
        kernel,
        out_shape=jax.ShapeDtypeStruct((rows, cols), dtype),
        grid_spec=pl.GridSpec(
            # Ragged last row-block is masked by Pallas; no row padding needed.
            grid=(pl.cdiv(rows, tile_m),),
            in_specs=[pl.BlockSpec((tile_m, cols), lambda i: (i, 0))],
            out_specs=pl.BlockSpec((tile_m, cols), lambda i: (i, 0)),
        ),
        compiler_params=pltpu.CompilerParams(
            # "parallel" lets the v7x megacore shard the row grid across both
            # TensorCores; no-op on single-TC v5e / v6e.
            # TODO(synk): verify in an xprof trace that both v7x TCs issue DMAs;
            # if not, add an explicit leading core axis via pl.core_map.
            dimension_semantics=("parallel",),
            vmem_limit_bytes=32 * 1024 * 1024,
        ),
    )(x_main)

    if main == total:
        return out_main.reshape(orig_shape)

    # <= cols-1 leftover elements: handle with plain jnp and stitch on.
    out_tail = _envelope_jnp(flat[main:], exponent)
    return jnp.concatenate([out_main.reshape(-1), out_tail]).reshape(orig_shape)


def envelope_ref(x: jnp.ndarray, exponent: float) -> jnp.ndarray:
    """Pure-JAX reference matching the PyTorch module semantics."""
    p = float(exponent) + 1.0
    a = -(p + 1.0) * (p + 2.0) / 2.0
    b = p * (p + 2.0)
    c = -p * (p + 1.0) / 2.0
    x_pow_p0 = jnp.power(x, p - 1.0)
    x_pow_p1 = x_pow_p0 * x
    x_pow_p2 = x_pow_p1 * x
    return 1.0 / x + a * x_pow_p0 + b * x_pow_p1 + c * x_pow_p2


if __name__ == "__main__":
    key = jax.random.PRNGKey(0)
    k1, k2, k3 = jax.random.split(key, 3)
    exponent = 5.0  # typical DimeNet envelope exponent

    # Envelope is applied to scaled distances in (0, 1]; keep inputs positive
    # and away from 0 so 1/x is well-conditioned.

    # 1) Aligned size -> exercises the Pallas kernel path directly.
    x_big = jax.random.uniform(k1, (8, 64, 256), dtype=jnp.float32,
                               minval=0.05, maxval=1.0)
    out_big = jax.block_until_ready(envelope(x_big, exponent))
    ref_big = envelope_ref(x_big, exponent)
    assert out_big.shape == ref_big.shape and out_big.dtype == ref_big.dtype
    assert jnp.allclose(out_big, ref_big, rtol=1e-5, atol=1e-5), "mismatch (aligned)"

    # 2) Unaligned size -> kernel on lane-aligned prefix + jnp tail.
    x_rag = jax.random.uniform(k2, (131072 + 77,), dtype=jnp.float32,
                               minval=0.05, maxval=1.0)
    out_rag = jax.block_until_ready(envelope(x_rag, exponent))
    ref_rag = envelope_ref(x_rag, exponent)
    assert jnp.allclose(out_rag, ref_rag, rtol=1e-5, atol=1e-5), "mismatch (ragged)"

    # 3) Tiny input consistent with the module's typical use -> jnp fast path.
    x_small = jax.random.uniform(k3, (2, 4, 16, 16), dtype=jnp.float32,
                                 minval=0.05, maxval=1.0)
    out_small = jax.block_until_ready(envelope(x_small, exponent))
    ref_small = envelope_ref(x_small, exponent)
    assert out_small.shape == ref_small.shape and out_small.dtype == ref_small.dtype
    assert jnp.allclose(out_small, ref_small, rtol=1e-5, atol=1e-5), "mismatch (small)"

    print("KERNEL_OK")
</pallas_src>

<mosaic_0001>
module attributes {stable_mosaic.version = 11 : i64} {
  func.func @_envelope_kernel(%arg0: i32, %arg1: memref<128x1024xf32, #tpu.memory_space<vmem>>, %arg2: memref<128x1024xf32, #tpu.memory_space<vmem>>) attributes {dimension_semantics = [#tpu.dimension_semantics<parallel>], iteration_bounds = array<i64: 1>, scalar_prefetch = 0 : i64, scratch_operands = 0 : i64, tpu.core_type = #tpu.core_type<tc>, window_params = [{transform_indices = @transform_0, window_bounds = array<i64: 128, 1024>}, {transform_indices = @transform_1, window_bounds = array<i64: 128, 1024>}]} {
    %c0 = arith.constant 0 : index
    %c0_0 = arith.constant 0 : index
    %0 = vector.load %arg1[%c0, %c0_0] : memref<128x1024xf32, #tpu.memory_space<vmem>>, vector<128x1024xf32>
    %1 = arith.mulf %0, %0 : vector<128x1024xf32>
    %2 = arith.mulf %1, %1 : vector<128x1024xf32>
    %3 = arith.mulf %0, %2 : vector<128x1024xf32>
    %cst = arith.constant 1.000000e+00 : f32
    %4 = vector.broadcast %cst : f32 to vector<128x1024xf32>
    %5 = arith.divf %4, %0 : vector<128x1024xf32>
    %cst_1 = arith.constant -2.100000e+01 : f32
    %6 = vector.broadcast %cst_1 : f32 to vector<128x1024xf32>
    %7 = arith.mulf %6, %0 : vector<128x1024xf32>
    %cst_2 = arith.constant 4.800000e+01 : f32
    %8 = vector.broadcast %cst_2 : f32 to vector<128x1024xf32>
    %9 = arith.addf %8, %7 : vector<128x1024xf32>
    %10 = arith.mulf %0, %9 : vector<128x1024xf32>
    %cst_3 = arith.constant -2.800000e+01 : f32
    %11 = vector.broadcast %cst_3 : f32 to vector<128x1024xf32>
    %12 = arith.addf %11, %10 : vector<128x1024xf32>
    %13 = arith.mulf %3, %12 : vector<128x1024xf32>
    %14 = arith.addf %5, %13 : vector<128x1024xf32>
    %c0_4 = arith.constant 0 : index
    %c0_5 = arith.constant 0 : index
    %15 = vector.load %arg2[%c0_4, %c0_5] : memref<128x1024xf32, #tpu.memory_space<vmem>>, vector<128x1024xf32>
    tpu.vector_store %arg2[%c0_4, %c0_5], %14 {strides = array<i32>} : memref<128x1024xf32, #tpu.memory_space<vmem>>, vector<128x1024xf32>,
    return
  }
  func.func @transform_0(%arg0: i32) -> (i32, i32) {
    %c0_i32 = arith.constant 0 : i32
    %c0_i32_0 = arith.constant 0 : i32
    return %arg0, %c0_i32 : i32, i32
  }
  func.func @transform_1(%arg0: i32) -> (i32, i32) {
    %c0_i32 = arith.constant 0 : i32
    %c0_i32_0 = arith.constant 0 : i32
    return %arg0, %c0_i32 : i32, i32
  }
}

</mosaic_0001>

<bundles_post_ra>
// kernel: tpu_custom_call.1
= control target key start
LH: loop header
LB: loop body
LE: loop exit
PB: predicated region body
PF: predicated region fallthrough
CT: control target
= control target key end

     0   :  { %6 = vsyncpa [#allocation3], 0  ;;  %s2056_s0 = inlined_call_operand.hbm [shape: f32[128,1024], index: 0, kind: input, shape index: {}]   ;;  %s2057_s1 = inlined_call_operand.hbm [shape: f32[128,1024], index: 1, kind: output, shape index: {}]  }
   0x1   :  { %7 = vsyncpa [#allocation4], 0  ;;  %s2012_s6 = smov [#allocation2]   ;;  %s1964_s10 = scalar_lea.hbm %s2056_s0, 16384 }
   0x2   :  { %s13_s7 = sshll.u32 %s2012_s6, 4  ;;  %p1965_p0 = scmp.ne.s32.totalorder %s2056_s0, %s1964_s10  ;;  %s14_s7 = int_to_ptr.vmem [resolvable:$true] %s13_s7 }
   0x3   :  { %p1968_p1 = scmp.lt.u32.totalorder %s1964_s10, %s2056_s0 }
   0x5   :  { %p1970_p2 = pnand %p1968_p1, %p1965_p0 }
   0x7   :  { %1973 = shalt.err (!%p1970_p2)
}
   0x8   :  { %s1974_s15 = scalar_lea.vmem %s14_s7, 16384  ;;  %p1979_p4 = scmp.lt.s32.totalorder %s14_s7, %s14_s7 }
   0x9   :  { %p1975_p3 = scmp.ne.s32.totalorder %s14_s7, %s1974_s15  ;;  %p1980_p5 = scmp.lt.s32.totalorder %s1974_s15, %s1974_s15 }
   0xb   :  { %p1981_p6 = por %p1980_p5, %p1979_p4 }
   0xd   :  { %p1982_p7 = pnand %p1981_p6, %p1975_p3 }
   0xf   :  { %1985 = shalt.err (!%p1982_p7)
}
  0x10   :  { %s2013_s16 = smov 1024   ;;  %s2014_s17 = smov 64  }
  0x11   :  { %19 = dma.hbm_to_vmem [thread:$0]  %s2056_s0, 16384, %s14_s7, [#allocation3], %s2013_s16, %s2013_s16, %s2014_s17  }
  0x12   :  { %2008 = dma.done.wait [#allocation3], 16384  }
  0x13   :  { %2009 = vsyncadd [#allocation3], 4294950912  ;;  %v23_v0 = vld [vmem:[#allocation2] sm:$0xff]  ;;  %v24_v1 = vld [vmem:[#allocation2 + $0x8] sm:$0xff]  ;;  %s2015_s0 = smov [#allocation5]  }
  0x14   :  { %v25_v2 = vld [vmem:[#allocation2 + $0x10] sm:$0xff]  ;;  %v151_v3 = vmul.f32 %v23_v0, %v23_v0  ;;  %1708 = vrcp.f32 %v23_v0  ;;  %v791_v4 = vmul.f32 -21.0, %v23_v0  ;;  %v152_v5 = vmul.f32 %v24_v1, %v24_v1  ;;  %v26_v9 = vld [vmem:[#allocation2 + $0x18] sm:$0xff]  ;;  %v27_v17 = vld [vmem:[#allocation2 + $0x20] sm:$0xff]  ;;  %s1692_s20 = sshll.u32 %s2015_s0, 4  ;;  %s1693_s20 = int_to_ptr.vmem [resolvable:$true] %s1692_s20 }
  0x15   :  { %1710 = vrcp.f32 %v24_v1  ;;  %v792_v6 = vmul.f32 -21.0, %v24_v1  ;;  %v153_v7 = vmul.f32 %v25_v2, %v25_v2  ;;  %v793_v8 = vmul.f32 -21.0, %v25_v2  ;;  %v28_v28 = vld [vmem:[#allocation2 + $0x28] sm:$0xff]  ;;  %v29_v37 = vld [vmem:[#allocation2 + $0x30] sm:$0xff]  ;;  %v30_v50 = vld [vmem:[#allocation2 + $0x38] sm:$0xff]  ;;  %s1986_s21 = scalar_lea.vmem %s1693_s20, 16384  ;;  %p1991_p9 = scmp.lt.s32.totalorder %s1693_s20, %s1693_s20 }
  0x16   :  { %v279_v10 = vmul.f32 %v151_v3, %v151_v3  ;;  %v919_v11 = vadd.f32 48.0, %v791_v4  ;;  %v280_v12 = vmul.f32 %v152_v5, %v152_v5  ;;  %1712 = vrcp.f32 %v25_v2  ;;  %p1987_p8 = scmp.ne.s32.totalorder %s1693_s20, %s1986_s21  ;;  %p1992_p10 = scmp.lt.s32.totalorder %s1986_s21, %s1986_s21 }
  0x17   :  { %v920_v13 = vadd.f32 48.0, %v792_v6  ;;  %v281_v14 = vmul.f32 %v153_v7, %v153_v7  ;;  %v921_v15 = vadd.f32 48.0, %v793_v8  ;;  %v154_v16 = vmul.f32 %v26_v9, %v26_v9 }
  0x18   :  { %v407_v18 = vmul.f32 %v279_v10, %v23_v0  ;;  %v1047_v19 = vmul.f32 %v919_v11, %v23_v0  ;;  %v408_v20 = vmul.f32 %v280_v12, %v24_v1  ;;  %1714 = vrcp.f32 %v26_v9  ;;  %v31_v0 = vld [vmem:[#allocation2 + $0x40] sm:$0xff]  ;;  %v32_v10 = vld [vmem:[#allocation2 + $0x48] sm:$0xff]  ;;  %p1993_p11 = por %p1992_p10, %p1991_p9 }
  0x19   :  { %v1048_v21 = vmul.f32 %v920_v13, %v24_v1  ;;  %v409_v22 = vmul.f32 %v281_v14, %v25_v2  ;;  %v1049_v23 = vmul.f32 %v921_v15, %v25_v2  ;;  %v282_v24 = vmul.f32 %v154_v16, %v154_v16 }
  0x1a   :  { %v1175_v25 = vadd.f32 -28.0, %v1047_v19  ;;  %v794_v26 = vmul.f32 -21.0, %v26_v9  ;;  %v155_v27 = vmul.f32 %v27_v17, %v27_v17  ;;  %1716 = vrcp.f32 %v27_v17  ;;  %p1994_p12 = pnand %p1993_p11, %p1987_p8 }
  0x1b   :  { %v1176_v29 = vadd.f32 -28.0, %v1048_v21  ;;  %v1177_v30 = vadd.f32 -28.0, %v1049_v23  ;;  %v410_v31 = vmul.f32 %v282_v24, %v26_v9  ;;  %v795_v32 = vmul.f32 -21.0, %v27_v17 }
  0x1c   :  { %v1303_v33 = vmul.f32 %v1175_v25, %v407_v18  ;;  %v922_v34 = vadd.f32 48.0, %v794_v26  ;;  %v283_v35 = vmul.f32 %v155_v27, %v155_v27  ;;  %v156_v36 = vmul.f32 %v28_v28, %v28_v28 }
  0x1d   :  { %v1304_v38 = vmul.f32 %v1176_v29, %v408_v20  ;;  %v1305_v39 = vmul.f32 %v1177_v30, %v409_v22  ;;  %v923_v40 = vadd.f32 48.0, %v795_v32  ;;  %1718 = vrcp.f32 %v28_v28  ;;  %v33_v22 = vld [vmem:[#allocation2 + $0x50] sm:$0xff] }
  0x1e   :  { %v1709_v41 = vpop.eup %1708  ;;  %v1050_v42 = vmul.f32 %v922_v34, %v26_v9  ;;  %v411_v43 = vmul.f32 %v283_v35, %v27_v17  ;;  %v284_v44 = vmul.f32 %v156_v36, %v156_v36  ;;  %v796_v45 = vmul.f32 -21.0, %v28_v28  ;;  %v34_v35 = vld [vmem:[#allocation2 + $0x58] sm:$0xff] }
  0x1f   :  { %v1711_v46 = vpop.eup %1710  ;;  %v1431_v47 = vadd.f32 %v1709_v41, %v1303_v33  ;;  %v1051_v48 = vmul.f32 %v923_v40, %v27_v17  ;;  %v157_v49 = vmul.f32 %v29_v37, %v29_v37  ;;  %1720 = vrcp.f32 %v29_v37 }
  0x20   :  { %v1713_v51 = vpop.eup %1712  ;;  %v1432_v52 = vadd.f32 %v1711_v46, %v1304_v38  ;;  %v1178_v53 = vadd.f32 -28.0, %v1050_v42  ;;  %v412_v54 = vmul.f32 %v284_v44, %v28_v28  ;;  %v924_v55 = vadd.f32 48.0, %v796_v45  ;;  %v35_v45 = vld [vmem:[#allocation2 + $0x60] sm:$0xff] }
  0x21   :  { %1559 = vst [vmem:[#allocation5] sm:$0xff] %v1431_v47  ;;  %v1433_v56 = vadd.f32 %v1713_v51, %v1305_v39  ;;  %v1179_v57 = vadd.f32 -28.0, %v1051_v48  ;;  %v285_v58 = vmul.f32 %v157_v49, %v157_v49  ;;  %v797_v59 = vmul.f32 -21.0, %v29_v37 }
  0x22   :  { %v1715_v60 = vpop.eup %1714  ;;  %1560 = vst [vmem:[#allocation5 + $0x8] sm:$0xff] %v1432_v52  ;;  %v1306_v61 = vmul.f32 %v1178_v53, %v410_v31  ;;  %v1052_v62 = vmul.f32 %v924_v55, %v28_v28  ;;  %v158_v63 = vmul.f32 %v30_v50, %v30_v50  ;;  %1722 = vrcp.f32 %v30_v50 }
  0x23   :  { %1561 = vst [vmem:[#allocation5 + $0x10] sm:$0xff] %v1433_v56  ;;  %v1307_v1 = vmul.f32 %v1179_v57, %v411_v43  ;;  %v413_v2 = vmul.f32 %v285_v58, %v29_v37  ;;  %v925_v3 = vadd.f32 48.0, %v797_v59  ;;  %v798_v4 = vmul.f32 -21.0, %v30_v50  ;;  %v36_v57 = vld [vmem:[#allocation2 + $0x68] sm:$0xff] }
  0x24   :  { %v1717_v5 = vpop.eup %1716  ;;  %v1434_v6 = vadd.f32 %v1715_v60, %v1306_v61  ;;  %v1180_v7 = vadd.f32 -28.0, %v1052_v62  ;;  %v286_v8 = vmul.f32 %v158_v63, %v158_v63  ;;  %v159_v9 = vmul.f32 %v31_v0, %v31_v0 }
  0x25   :  { %v1435_v11 = vadd.f32 %v1717_v5, %v1307_v1  ;;  %v1053_v12 = vmul.f32 %v925_v3, %v29_v37  ;;  %v926_v13 = vadd.f32 48.0, %v798_v4  ;;  %1724 = vrcp.f32 %v31_v0  ;;  %v37_v3 = vld [vmem:[#allocation2 + $0x70] sm:$0xff] }
  0x26   :  { %1562 = vst [vmem:[#allocation5 + $0x18] sm:$0xff] %v1434_v6  ;;  %v1308_v14 = vmul.f32 %v1180_v7, %v412_v54  ;;  %v414_v15 = vmul.f32 %v286_v8, %v30_v50  ;;  %v287_v16 = vmul.f32 %v159_v9, %v159_v9  ;;  %v799_v17 = vmul.f32 -21.0, %v31_v0 }
  0x27   :  { %v1719_v18 = vpop.eup %1718  ;;  %1563 = vst [vmem:[#allocation5 + $0x20] sm:$0xff] %v1435_v11  ;;  %v1181_v19 = vadd.f32 -28.0, %v1053_v12  ;;  %v1054_v20 = vmul.f32 %v926_v13, %v30_v50  ;;  %v160_v21 = vmul.f32 %v32_v10, %v32_v10  ;;  %1726 = vrcp.f32 %v32_v10 }
  0x28   :  { %v1436_v23 = vadd.f32 %v1719_v18, %v1308_v14  ;;  %v415_v24 = vmul.f32 %v287_v16, %v31_v0  ;;  %v927_v25 = vadd.f32 48.0, %v799_v17  ;;  %v800_v26 = vmul.f32 -21.0, %v32_v10 }
  0x29   :  { %v1721_v27 = vpop.eup %1720  ;;  %v1309_v28 = vmul.f32 %v1181_v19, %v413_v2  ;;  %v1182_v29 = vadd.f32 -28.0, %v1054_v20  ;;  %v288_v30 = vmul.f32 %v160_v21, %v160_v21  ;;  %v161_v31 = vmul.f32 %v33_v22, %v33_v22 }
  0x2a   :  { %1564 = vst [vmem:[#allocation5 + $0x28] sm:$0xff] %v1436_v23  ;;  %v1055_v32 = vmul.f32 %v927_v25, %v31_v0  ;;  %v928_v33 = vadd.f32 48.0, %v800_v26  ;;  %1728 = vrcp.f32 %v33_v22  ;;  %v801_v34 = vmul.f32 -21.0, %v33_v22 }
  0x2b   :  { %v1437_v36 = vadd.f32 %v1721_v27, %v1309_v28  ;;  %v1310_v37 = vmul.f32 %v1182_v29, %v414_v15  ;;  %v416_v38 = vmul.f32 %v288_v30, %v32_v10  ;;  %v289_v39 = vmul.f32 %v161_v31, %v161_v31  ;;  %v38_v15 = vld [vmem:[#allocation2 + $0x78] sm:$0xff] }
  0x2c   :  { %v1723_v40 = vpop.eup %1722  ;;  %v1183_v41 = vadd.f32 -28.0, %v1055_v32  ;;  %v1056_v42 = vmul.f32 %v928_v33, %v32_v10  ;;  %v929_v43 = vadd.f32 48.0, %v801_v34  ;;  %v162_v44 = vmul.f32 %v34_v35, %v34_v35 }
  0x2d   :  { %1565 = vst [vmem:[#allocation5 + $0x30] sm:$0xff] %v1437_v36  ;;  %v1438_v46 = vadd.f32 %v1723_v40, %v1310_v37  ;;  %v417_v47 = vmul.f32 %v289_v39, %v33_v22  ;;  %1730 = vrcp.f32 %v34_v35  ;;  %v802_v48 = vmul.f32 -21.0, %v34_v35  ;;  %v40_v37 = vld [vmem:[#allocation2 + $0x88] sm:$0xff] }
  0x2e   :  { %v1311_v49 = vmul.f32 %v1183_v41, %v415_v24  ;;  %v1184_v50 = vadd.f32 -28.0, %v1056_v42  ;;  %v1057_v51 = vmul.f32 %v929_v43, %v33_v22  ;;  %v290_v52 = vmul.f32 %v162_v44, %v162_v44  ;;  %v39_v24 = vld [vmem:[#allocation2 + $0x80] sm:$0xff] }
  0x2f   :  { %v1725_v53 = vpop.eup %1724  ;;  %1566 = vst [vmem:[#allocation5 + $0x38] sm:$0xff] %v1438_v46  ;;  %v930_v54 = vadd.f32 48.0, %v802_v48  ;;  %v163_v55 = vmul.f32 %v35_v45, %v35_v45  ;;  %1732 = vrcp.f32 %v35_v45  ;;  %v803_v56 = vmul.f32 -21.0, %v35_v45  ;;  %v41_v46 = vld [vmem:[#allocation2 + $0x90] sm:$0xff] }
  0x30   :  { %v1439_v58 = vadd.f32 %v1725_v53, %v1311_v49  ;;  %v1312_v59 = vmul.f32 %v1184_v50, %v416_v38  ;;  %v1185_v60 = vadd.f32 -28.0, %v1057_v51  ;;  %v418_v61 = vmul.f32 %v290_v52, %v34_v35 }
  0x31   :  { %v1727_v62 = vpop.eup %1726  ;;  %v1058_v63 = vmul.f32 %v930_v54, %v34_v35  ;;  %v291_v0 = vmul.f32 %v163_v55, %v163_v55  ;;  %v931_v1 = vadd.f32 48.0, %v803_v56  ;;  %v164_v2 = vmul.f32 %v36_v57, %v36_v57 }
  0x32   :  { %1567 = vst [vmem:[#allocation5 + $0x40] sm:$0xff] %v1439_v58  ;;  %v1440_v4 = vadd.f32 %v1727_v62, %v1312_v59  ;;  %v1313_v5 = vmul.f32 %v1185_v60, %v417_v47  ;;  %1734 = vrcp.f32 %v36_v57  ;;  %v804_v6 = vmul.f32 -21.0, %v36_v57  ;;  %v42_v59 = vld [vmem:[#allocation2 + $0x98] sm:$0xff] }
  0x33   :  { %v1186_v7 = vadd.f32 -28.0, %v1058_v63  ;;  %v419_v8 = vmul.f32 %v291_v0, %v35_v45  ;;  %v1059_v9 = vmul.f32 %v931_v1, %v35_v45  ;;  %v292_v10 = vmul.f32 %v164_v2, %v164_v2 }
  0x34   :  { %v1729_v11 = vpop.eup %1728  ;;  %1568 = vst [vmem:[#allocation5 + $0x48] sm:$0xff] %v1440_v4  ;;  %v932_v12 = vadd.f32 48.0, %v804_v6  ;;  %v165_v13 = vmul.f32 %v37_v3, %v37_v3  ;;  %1736 = vrcp.f32 %v37_v3  ;;  %v805_v14 = vmul.f32 -21.0, %v37_v3  ;;  %v43_v4 = vld [vmem:[#allocation2 + $0xa0] sm:$0xff] }
  0x35   :  { %v1441_v16 = vadd.f32 %v1729_v11, %v1313_v5  ;;  %v1314_v17 = vmul.f32 %v1186_v7, %v418_v61  ;;  %v1187_v18 = vadd.f32 -28.0, %v1059_v9  ;;  %v420_v19 = vmul.f32 %v292_v10, %v36_v57 }
  0x36   :  { %v1060_v20 = vmul.f32 %v932_v12, %v36_v57  ;;  %v293_v21 = vmul.f32 %v165_v13, %v165_v13  ;;  %v933_v22 = vadd.f32 48.0, %v805_v14  ;;  %v166_v23 = vmul.f32 %v38_v15, %v38_v15 }
  0x37   :  { %v1731_v25 = vpop.eup %1730  ;;  %1569 = vst [vmem:[#allocation5 + $0x50] sm:$0xff] %v1441_v16  ;;  %v1315_v26 = vmul.f32 %v1187_v18, %v419_v8  ;;  %1738 = vrcp.f32 %v38_v15  ;;  %v806_v27 = vmul.f32 -21.0, %v38_v15  ;;  %v167_v28 = vmul.f32 %v39_v24, %v39_v24 }
  0x38   :  { %v1442_v29 = vadd.f32 %v1731_v25, %v1314_v17  ;;  %v1188_v30 = vadd.f32 -28.0, %v1060_v20  ;;  %v421_v31 = vmul.f32 %v293_v21, %v37_v3  ;;  %v1061_v32 = vmul.f32 %v933_v22, %v37_v3  ;;  %v44_v17 = vld [vmem:[#allocation2 + $0xa8] sm:$0xff] }
  0x39   :  { %v1733_v33 = vpop.eup %1732  ;;  %v294_v34 = vmul.f32 %v166_v23, %v166_v23  ;;  %v934_v35 = vadd.f32 48.0, %v806_v27  ;;  %v295_v36 = vmul.f32 %v167_v28, %v167_v28  ;;  %1740 = vrcp.f32 %v39_v24 }
  0x3a   :  { %1570 = vst [vmem:[#allocation5 + $0x58] sm:$0xff] %v1442_v29  ;;  %v1443_v38 = vadd.f32 %v1733_v33, %v1315_v26  ;;  %v1316_v39 = vmul.f32 %v1188_v30, %v420_v19  ;;  %v1189_v40 = vadd.f32 -28.0, %v1061_v32  ;;  %v807_v41 = vmul.f32 -21.0, %v39_v24  ;;  %v45_v26 = vld [vmem:[#allocation2 + $0xb0] sm:$0xff] }
  0x3b   :  { %v422_v42 = vmul.f32 %v294_v34, %v38_v15  ;;  %v1062_v43 = vmul.f32 %v934_v35, %v38_v15  ;;  %v423_v44 = vmul.f32 %v295_v36, %v39_v24  ;;  %v168_v45 = vmul.f32 %v40_v37, %v40_v37 }
  0x3c   :  { %v1735_v47 = vpop.eup %1734  ;;  %1571 = vst [vmem:[#allocation5 + $0x60] sm:$0xff] %v1443_v38  ;;  %v1317_v48 = vmul.f32 %v1189_v40, %v421_v31  ;;  %v935_v49 = vadd.f32 48.0, %v807_v41  ;;  %1742 = vrcp.f32 %v40_v37  ;;  %v808_v50 = vmul.f32 -21.0, %v40_v37 }
  0x3d   :  { %v1444_v51 = vadd.f32 %v1735_v47, %v1316_v39  ;;  %v1190_v52 = vadd.f32 -28.0, %v1062_v43  ;;  %v296_v53 = vmul.f32 %v168_v45, %v168_v45  ;;  %v169_v54 = vmul.f32 %v41_v46, %v41_v46  ;;  %v46_v39 = vld [vmem:[#allocation2 + $0xb8] sm:$0xff] }
  0x3e   :  { %v1737_v55 = vpop.eup %1736  ;;  %v1063_v56 = vmul.f32 %v935_v49, %v39_v24  ;;  %v936_v57 = vadd.f32 48.0, %v808_v50  ;;  %1744 = vrcp.f32 %v41_v46  ;;  %v809_v58 = vmul.f32 -21.0, %v41_v46 }
  0x3f   :  { %1572 = vst [vmem:[#allocation5 + $0x68] sm:$0xff] %v1444_v51  ;;  %v1445_v60 = vadd.f32 %v1737_v55, %v1317_v48  ;;  %v1318_v61 = vmul.f32 %v1190_v52, %v422_v42  ;;  %v424_v62 = vmul.f32 %v296_v53, %v40_v37  ;;  %v297_v63 = vmul.f32 %v169_v54, %v169_v54  ;;  %v47_v48 = vld [vmem:[#allocation2 + $0xc0] sm:$0xff] }
  0x40   :  { %v1191_v0 = vadd.f32 -28.0, %v1063_v56  ;;  %v1064_v1 = vmul.f32 %v936_v57, %v40_v37  ;;  %v937_v2 = vadd.f32 48.0, %v809_v58  ;;  %v170_v3 = vmul.f32 %v42_v59, %v42_v59 }
  0x41   :  { %v1739_v5 = vpop.eup %1738  ;;  %1573 = vst [vmem:[#allocation5 + $0x70] sm:$0xff] %v1445_v60  ;;  %v425_v6 = vmul.f32 %v297_v63, %v41_v46  ;;  %1746 = vrcp.f32 %v42_v59  ;;  %v810_v7 = vmul.f32 -21.0, %v42_v59  ;;  %v171_v8 = vmul.f32 %v43_v4, %v43_v4 }
  0x42   :  { %v1446_v9 = vadd.f32 %v1739_v5, %v1318_v61  ;;  %v1319_v10 = vmul.f32 %v1191_v0, %v423_v44  ;;  %v1192_v11 = vadd.f32 -28.0, %v1064_v1  ;;  %v1065_v12 = vmul.f32 %v937_v2, %v41_v46  ;;  %v48_v61 = vld [vmem:[#allocation2 + $0xc8] sm:$0xff] }
  0x43   :  { %v1741_v13 = vpop.eup %1740  ;;  %v298_v14 = vmul.f32 %v170_v3, %v170_v3  ;;  %v938_v15 = vadd.f32 48.0, %v810_v7  ;;  %v299_v16 = vmul.f32 %v171_v8, %v171_v8  ;;  %1748 = vrcp.f32 %v43_v4 }
  0x44   :  { %1574 = vst [vmem:[#allocation5 + $0x78] sm:$0xff] %v1446_v9  ;;  %v1447_v18 = vadd.f32 %v1741_v13, %v1319_v10  ;;  %v1320_v19 = vmul.f32 %v1192_v11, %v424_v62  ;;  %v1193_v20 = vadd.f32 -28.0, %v1065_v12  ;;  %v811_v21 = vmul.f32 -21.0, %v43_v4 }
  0x45   :  { %v426_v22 = vmul.f32 %v298_v14, %v42_v59  ;;  %v1066_v23 = vmul.f32 %v938_v15, %v42_v59  ;;  %v427_v24 = vmul.f32 %v299_v16, %v43_v4  ;;  %v172_v25 = vmul.f32 %v44_v17, %v44_v17 }
  0x46   :  { %v1743_v27 = vpop.eup %1742  ;;  %1575 = vst [vmem:[#allocation5 + $0x80] sm:$0xff] %v1447_v18  ;;  %v1321_v28 = vmul.f32 %v1193_v20, %v425_v6  ;;  %v939_v29 = vadd.f32 48.0, %v811_v21  ;;  %1750 = vrcp.f32 %v44_v17  ;;  %v812_v30 = vmul.f32 -21.0, %v44_v17  ;;  %v49_v6 = vld [vmem:[#allocation2 + $0xd0] sm:$0xff] }
  0x47   :  { %v1448_v31 = vadd.f32 %v1743_v27, %v1320_v19  ;;  %v1194_v32 = vadd.f32 -28.0, %v1066_v23  ;;  %v300_v33 = vmul.f32 %v172_v25, %v172_v25  ;;  %v173_v34 = vmul.f32 %v45_v26, %v45_v26  ;;  %v50_v19 = vld [vmem:[#allocation2 + $0xd8] sm:$0xff] }
  0x48   :  { %v1745_v35 = vpop.eup %1744  ;;  %v1067_v36 = vmul.f32 %v939_v29, %v43_v4  ;;  %v940_v37 = vadd.f32 48.0, %v812_v30  ;;  %1752 = vrcp.f32 %v45_v26  ;;  %v813_v38 = vmul.f32 -21.0, %v45_v26 }
  0x49   :  { %1576 = vst [vmem:[#allocation5 + $0x88] sm:$0xff] %v1448_v31  ;;  %v1449_v40 = vadd.f32 %v1745_v35, %v1321_v28  ;;  %v1322_v41 = vmul.f32 %v1194_v32, %v426_v22  ;;  %v428_v42 = vmul.f32 %v300_v33, %v44_v17  ;;  %v301_v43 = vmul.f32 %v173_v34, %v173_v34  ;;  %v51_v28 = vld [vmem:[#allocation2 + $0xe0] sm:$0xff] }
  0x4a   :  { %v1195_v44 = vadd.f32 -28.0, %v1067_v36  ;;  %v1068_v45 = vmul.f32 %v940_v37, %v44_v17  ;;  %v941_v46 = vadd.f32 48.0, %v813_v38  ;;  %v174_v47 = vmul.f32 %v46_v39, %v46_v39 }
  0x4b   :  { %v1747_v49 = vpop.eup %1746  ;;  %1577 = vst [vmem:[#allocation5 + $0x90] sm:$0xff] %v1449_v40  ;;  %v429_v50 = vmul.f32 %v301_v43, %v45_v26  ;;  %1754 = vrcp.f32 %v46_v39  ;;  %v814_v51 = vmul.f32 -21.0, %v46_v39  ;;  %v175_v52 = vmul.f32 %v47_v48, %v47_v48 }
  0x4c   :  { %v1450_v53 = vadd.f32 %v1747_v49, %v1322_v41  ;;  %v1323_v54 = vmul.f32 %v1195_v44, %v427_v24  ;;  %v1196_v55 = vadd.f32 -28.0, %v1068_v45  ;;  %v1069_v56 = vmul.f32 %v941_v46, %v45_v26  ;;  %v52_v41 = vld [vmem:[#allocation2 + $0xe8] sm:$0xff] }
  0x4d   :  { %v1749_v57 = vpop.eup %1748  ;;  %v302_v58 = vmul.f32 %v174_v47, %v174_v47  ;;  %v942_v59 = vadd.f32 48.0, %v814_v51  ;;  %v303_v60 = vmul.f32 %v175_v52, %v175_v52  ;;  %1756 = vrcp.f32 %v47_v48 }
  0x4e   :  { %1578 = vst [vmem:[#allocation5 + $0x98] sm:$0xff] %v1450_v53  ;;  %v1451_v62 = vadd.f32 %v1749_v57, %v1323_v54  ;;  %v1324_v63 = vmul.f32 %v1196_v55, %v428_v42  ;;  %v1197_v0 = vadd.f32 -28.0, %v1069_v56  ;;  %v815_v1 = vmul.f32 -21.0, %v47_v48 }
  0x4f   :  { %v430_v2 = vmul.f32 %v302_v58, %v46_v39  ;;  %v1070_v3 = vmul.f32 %v942_v59, %v46_v39  ;;  %v431_v4 = vmul.f32 %v303_v60, %v47_v48  ;;  %v176_v5 = vmul.f32 %v48_v61, %v48_v61 }
  0x50   :  { %v1751_v7 = vpop.eup %1750  ;;  %1579 = vst [vmem:[#allocation5 + $0xa0] sm:$0xff] %v1451_v62  ;;  %v1325_v8 = vmul.f32 %v1197_v0, %v429_v50  ;;  %v943_v9 = vadd.f32 48.0, %v815_v1  ;;  %1758 = vrcp.f32 %v48_v61  ;;  %v816_v10 = vmul.f32 -21.0, %v48_v61  ;;  %v53_v50 = vld [vmem:[#allocation2 + $0xf0] sm:$0xff] }
  0x51   :  { %v1452_v11 = vadd.f32 %v1751_v7, %v1324_v63  ;;  %v1198_v12 = vadd.f32 -28.0, %v1070_v3  ;;  %v304_v13 = vmul.f32 %v176_v5, %v176_v5  ;;  %v177_v14 = vmul.f32 %v49_v6, %v49_v6  ;;  %v54_v63 = vld [vmem:[#allocation2 + $0xf8] sm:$0xff] }
  0x52   :  { %v1753_v15 = vpop.eup %1752  ;;  %v1071_v16 = vmul.f32 %v943_v9, %v47_v48  ;;  %v944_v17 = vadd.f32 48.0, %v816_v10  ;;  %1760 = vrcp.f32 %v49_v6  ;;  %v817_v18 = vmul.f32 -21.0, %v49_v6 }
  0x53   :  { %1580 = vst [vmem:[#allocation5 + $0xa8] sm:$0xff] %v1452_v11  ;;  %v1453_v20 = vadd.f32 %v1753_v15, %v1325_v8  ;;  %v1326_v21 = vmul.f32 %v1198_v12, %v430_v2  ;;  %v432_v22 = vmul.f32 %v304_v13, %v48_v61  ;;  %v305_v23 = vmul.f32 %v177_v14, %v177_v14  ;;  %v55_v8 = vld [vmem:[#allocation2 + $0x100] sm:$0xff] }
  0x54   :  { %v1199_v24 = vadd.f32 -28.0, %v1071_v16  ;;  %v1072_v25 = vmul.f32 %v944_v17, %v48_v61  ;;  %v945_v26 = vadd.f32 48.0, %v817_v18  ;;  %v178_v27 = vmul.f32 %v50_v19, %v50_v19 }
  0x55   :  { %v1755_v29 = vpop.eup %1754  ;;  %1581 = vst [vmem:[#allocation5 + $0xb0] sm:$0xff] %v1453_v20  ;;  %v433_v30 = vmul.f32 %v305_v23, %v49_v6  ;;  %1762 = vrcp.f32 %v50_v19  ;;  %v818_v31 = vmul.f32 -21.0, %v50_v19  ;;  %v179_v32 = vmul.f32 %v51_v28, %v51_v28 }
  0x56   :  { %v1454_v33 = vadd.f32 %v1755_v29, %v1326_v21  ;;  %v1327_v34 = vmul.f32 %v1199_v24, %v431_v4  ;;  %v1200_v35 = vadd.f32 -28.0, %v1072_v25  ;;  %v1073_v36 = vmul.f32 %v945_v26, %v49_v6  ;;  %v56_v21 = vld [vmem:[#allocation2 + $0x108] sm:$0xff] }
  0x57   :  { %v1757_v37 = vpop.eup %1756  ;;  %v306_v38 = vmul.f32 %v178_v27, %v178_v27  ;;  %v946_v39 = vadd.f32 48.0, %v818_v31  ;;  %v307_v40 = vmul.f32 %v179_v32, %v179_v32  ;;  %1764 = vrcp.f32 %v51_v28 }
  0x58   :  { %1582 = vst [vmem:[#allocation5 + $0xb8] sm:$0xff] %v1454_v33  ;;  %v1455_v42 = vadd.f32 %v1757_v37, %v1327_v34  ;;  %v1328_v43 = vmul.f32 %v1200_v35, %v432_v22  ;;  %v1201_v44 = vadd.f32 -28.0, %v1073_v36  ;;  %v819_v45 = vmul.f32 -21.0, %v51_v28 }
  0x59   :  { %v434_v46 = vmul.f32 %v306_v38, %v50_v19  ;;  %v1074_v47 = vmul.f32 %v946_v39, %v50_v19  ;;  %v435_v48 = vmul.f32 %v307_v40, %v51_v28  ;;  %v180_v49 = vmul.f32 %v52_v41, %v52_v41 }
  0x5a   :  { %v1759_v51 = vpop.eup %1758  ;;  %1583 = vst [vmem:[#allocation5 + $0xc0] sm:$0xff] %v1455_v42  ;;  %v1329_v52 = vmul.f32 %v1201_v44, %v433_v30  ;;  %v947_v53 = vadd.f32 48.0, %v819_v45  ;;  %1766 = vrcp.f32 %v52_v41  ;;  %v820_v54 = vmul.f32 -21.0, %v52_v41  ;;  %v57_v30 = vld [vmem:[#allocation2 + $0x110] sm:$0xff] }
  0x5b   :  { %v1456_v55 = vadd.f32 %v1759_v51, %v1328_v43  ;;  %v1202_v56 = vadd.f32 -28.0, %v1074_v47  ;;  %v308_v57 = vmul.f32 %v180_v49, %v180_v49  ;;  %v181_v58 = vmul.f32 %v53_v50, %v53_v50  ;;  %v58_v43 = vld [vmem:[#allocation2 + $0x118] sm:$0xff] }
  0x5c   :  { %v1761_v59 = vpop.eup %1760  ;;  %v1075_v60 = vmul.f32 %v947_v53, %v51_v28  ;;  %v948_v61 = vadd.f32 48.0, %v820_v54  ;;  %1768 = vrcp.f32 %v53_v50  ;;  %v821_v62 = vmul.f32 -21.0, %v53_v50 }
  0x5d   :  { %1584 = vst [vmem:[#allocation5 + $0xc8] sm:$0xff] %v1456_v55  ;;  %v1457_v0 = vadd.f32 %v1761_v59, %v1329_v52  ;;  %v1330_v1 = vmul.f32 %v1202_v56, %v434_v46  ;;  %v436_v2 = vmul.f32 %v308_v57, %v52_v41  ;;  %v309_v3 = vmul.f32 %v181_v58, %v181_v58  ;;  %v59_v52 = vld [vmem:[#allocation2 + $0x120] sm:$0xff] }
  0x5e   :  { %v1203_v4 = vadd.f32 -28.0, %v1075_v60  ;;  %v1076_v5 = vmul.f32 %v948_v61, %v52_v41  ;;  %v949_v6 = vadd.f32 48.0, %v821_v62  ;;  %v182_v7 = vmul.f32 %v54_v63, %v54_v63 }
  0x5f   :  { %v1763_v9 = vpop.eup %1762  ;;  %1585 = vst [vmem:[#allocation5 + $0xd0] sm:$0xff] %v1457_v0  ;;  %v437_v10 = vmul.f32 %v309_v3, %v53_v50  ;;  %1770 = vrcp.f32 %v54_v63  ;;  %v822_v11 = vmul.f32 -21.0, %v54_v63  ;;  %v183_v12 = vmul.f32 %v55_v8, %v55_v8 }
  0x60   :  { %v1458_v13 = vadd.f32 %v1763_v9, %v1330_v1  ;;  %v1331_v14 = vmul.f32 %v1203_v4, %v435_v48  ;;  %v1204_v15 = vadd.f32 -28.0, %v1076_v5  ;;  %v1077_v16 = vmul.f32 %v949_v6, %v53_v50  ;;  %v60_v1 = vld [vmem:[#allocation2 + $0x128] sm:$0xff] }
  0x61   :  { %v1765_v17 = vpop.eup %1764  ;;  %v310_v18 = vmul.f32 %v182_v7, %v182_v7  ;;  %v950_v19 = vadd.f32 48.0, %v822_v11  ;;  %v311_v20 = vmul.f32 %v183_v12, %v183_v12  ;;  %1772 = vrcp.f32 %v55_v8 }
  0x62   :  { %1586 = vst [vmem:[#allocation5 + $0xd8] sm:$0xff] %v1458_v13  ;;  %v1459_v22 = vadd.f32 %v1765_v17, %v1331_v14  ;;  %v1332_v23 = vmul.f32 %v1204_v15, %v436_v2  ;;  %v1205_v24 = vadd.f32 -28.0, %v1077_v16  ;;  %v823_v25 = vmul.f32 -21.0, %v55_v8 }
  0x63   :  { %v438_v26 = vmul.f32 %v310_v18, %v54_v63  ;;  %v1078_v27 = vmul.f32 %v950_v19, %v54_v63  ;;  %v439_v28 = vmul.f32 %v311_v20, %v55_v8  ;;  %v184_v29 = vmul.f32 %v56_v21, %v56_v21 }
  0x64   :  { %v1767_v31 = vpop.eup %1766  ;;  %1587 = vst [vmem:[#allocation5 + $0xe0] sm:$0xff] %v1459_v22  ;;  %v1333_v32 = vmul.f32 %v1205_v24, %v437_v10  ;;  %v951_v33 = vadd.f32 48.0, %v823_v25  ;;  %1774 = vrcp.f32 %v56_v21  ;;  %v824_v34 = vmul.f32 -21.0, %v56_v21  ;;  %v61_v10 = vld [vmem:[#allocation2 + $0x130] sm:$0xff] }
  0x65   :  { %v1460_v35 = vadd.f32 %v1767_v31, %v1332_v23  ;;  %v1206_v36 = vadd.f32 -28.0, %v1078_v27  ;;  %v312_v37 = vmul.f32 %v184_v29, %v184_v29  ;;  %v185_v38 = vmul.f32 %v57_v30, %v57_v30  ;;  %v62_v23 = vld [vmem:[#allocation2 + $0x138] sm:$0xff] }
  0x66   :  { %v1769_v39 = vpop.eup %1768  ;;  %v1079_v40 = vmul.f32 %v951_v33, %v55_v8  ;;  %v952_v41 = vadd.f32 48.0, %v824_v34  ;;  %1776 = vrcp.f32 %v57_v30  ;;  %v825_v42 = vmul.f32 -21.0, %v57_v30 }
  0x67   :  { %1588 = vst [vmem:[#allocation5 + $0xe8] sm:$0xff] %v1460_v35  ;;  %v1461_v44 = vadd.f32 %v1769_v39, %v1333_v32  ;;  %v1334_v45 = vmul.f32 %v1206_v36, %v438_v26  ;;  %v440_v46 = vmul.f32 %v312_v37, %v56_v21  ;;  %v313_v47 = vmul.f32 %v185_v38, %v185_v38  ;;  %v63_v32 = vld [vmem:[#allocation2 + $0x140] sm:$0xff] }
  0x68   :  { %v1207_v48 = vadd.f32 -28.0, %v1079_v40  ;;  %v1080_v49 = vmul.f32 %v952_v41, %v56_v21  ;;  %v953_v50 = vadd.f32 48.0, %v825_v42  ;;  %v186_v51 = vmul.f32 %v58_v43, %v58_v43 }
  0x69   :  { %v1771_v53 = vpop.eup %1770  ;;  %1589 = vst [vmem:[#allocation5 + $0xf0] sm:$0xff] %v1461_v44  ;;  %v441_v54 = vmul.f32 %v313_v47, %v57_v30  ;;  %1778 = vrcp.f32 %v58_v43  ;;  %v826_v55 = vmul.f32 -21.0, %v58_v43  ;;  %v187_v56 = vmul.f32 %v59_v52, %v59_v52 }
  0x6a   :  { %v1462_v57 = vadd.f32 %v1771_v53, %v1334_v45  ;;  %v1335_v58 = vmul.f32 %v1207_v48, %v439_v28  ;;  %v1208_v59 = vadd.f32 -28.0, %v1080_v49  ;;  %v1081_v60 = vmul.f32 %v953_v50, %v57_v30  ;;  %v64_v45 = vld [vmem:[#allocation2 + $0x148] sm:$0xff] }
  0x6b   :  { %v1773_v61 = vpop.eup %1772  ;;  %v314_v62 = vmul.f32 %v186_v51, %v186_v51  ;;  %v954_v63 = vadd.f32 48.0, %v826_v55  ;;  %v315_v0 = vmul.f32 %v187_v56, %v187_v56  ;;  %1780 = vrcp.f32 %v59_v52 }
  0x6c   :  { %1590 = vst [vmem:[#allocation5 + $0xf8] sm:$0xff] %v1462_v57  ;;  %v1463_v2 = vadd.f32 %v1773_v61, %v1335_v58  ;;  %v1336_v3 = vmul.f32 %v1208_v59, %v440_v46  ;;  %v1209_v4 = vadd.f32 -28.0, %v1081_v60  ;;  %v827_v5 = vmul.f32 -21.0, %v59_v52 }
  0x6d   :  { %v442_v6 = vmul.f32 %v314_v62, %v58_v43  ;;  %v1082_v7 = vmul.f32 %v954_v63, %v58_v43  ;;  %v443_v8 = vmul.f32 %v315_v0, %v59_v52  ;;  %v188_v9 = vmul.f32 %v60_v1, %v60_v1 }
  0x6e   :  { %v1775_v11 = vpop.eup %1774  ;;  %1591 = vst [vmem:[#allocation5 + $0x100] sm:$0xff] %v1463_v2  ;;  %v1337_v12 = vmul.f32 %v1209_v4, %v441_v54  ;;  %v955_v13 = vadd.f32 48.0, %v827_v5  ;;  %1782 = vrcp.f32 %v60_v1  ;;  %v828_v14 = vmul.f32 -21.0, %v60_v1  ;;  %v65_v54 = vld [vmem:[#allocation2 + $0x150] sm:$0xff] }
  0x6f   :  { %v1464_v15 = vadd.f32 %v1775_v11, %v1336_v3  ;;  %v1210_v16 = vadd.f32 -28.0, %v1082_v7  ;;  %v316_v17 = vmul.f32 %v188_v9, %v188_v9  ;;  %v189_v18 = vmul.f32 %v61_v10, %v61_v10  ;;  %v66_v3 = vld [vmem:[#allocation2 + $0x158] sm:$0xff] }
  0x70   :  { %v1777_v19 = vpop.eup %1776  ;;  %v1083_v20 = vmul.f32 %v955_v13, %v59_v52  ;;  %v956_v21 = vadd.f32 48.0, %v828_v14  ;;  %1784 = vrcp.f32 %v61_v10  ;;  %v829_v22 = vmul.f32 -21.0, %v61_v10 }
  0x71   :  { %1592 = vst [vmem:[#allocation5 + $0x108] sm:$0xff] %v1464_v15  ;;  %v1465_v24 = vadd.f32 %v1777_v19, %v1337_v12  ;;  %v1338_v25 = vmul.f32 %v1210_v16, %v442_v6  ;;  %v444_v26 = vmul.f32 %v316_v17, %v60_v1  ;;  %v317_v27 = vmul.f32 %v189_v18, %v189_v18  ;;  %v67_v12 = vld [vmem:[#allocation2 + $0x160] sm:$0xff] }
  0x72   :  { %v1211_v28 = vadd.f32 -28.0, %v1083_v20  ;;  %v1084_v29 = vmul.f32 %v956_v21, %v60_v1  ;;  %v957_v30 = vadd.f32 48.0, %v829_v22  ;;  %v190_v31 = vmul.f32 %v62_v23, %v62_v23 }
  0x73   :  { %v1779_v33 = vpop.eup %1778  ;;  %1593 = vst [vmem:[#allocation5 + $0x110] sm:$0xff] %v1465_v24  ;;  %v445_v34 = vmul.f32 %v317_v27, %v61_v10  ;;  %1786 = vrcp.f32 %v62_v23  ;;  %v830_v35 = vmul.f32 -21.0, %v62_v23  ;;  %v191_v36 = vmul.f32 %v63_v32, %v63_v32 }
  0x74   :  { %v1466_v37 = vadd.f32 %v1779_v33, %v1338_v25  ;;  %v1339_v38 = vmul.f32 %v1211_v28, %v443_v8  ;;  %v1212_v39 = vadd.f32 -28.0, %v1084_v29  ;;  %v1085_v40 = vmul.f32 %v957_v30, %v61_v10  ;;  %v68_v25 = vld [vmem:[#allocation2 + $0x168] sm:$0xff] }
  0x75   :  { %v1781_v41 = vpop.eup %1780  ;;  %v318_v42 = vmul.f32 %v190_v31, %v190_v31  ;;  %v958_v43 = vadd.f32 48.0, %v830_v35  ;;  %v319_v44 = vmul.f32 %v191_v36, %v191_v36  ;;  %1788 = vrcp.f32 %v63_v32 }
  0x76   :  { %1594 = vst [vmem:[#allocation5 + $0x118] sm:$0xff] %v1466_v37  ;;  %v1467_v46 = vadd.f32 %v1781_v41, %v1339_v38  ;;  %v1340_v47 = vmul.f32 %v1212_v39, %v444_v26  ;;  %v1213_v48 = vadd.f32 -28.0, %v1085_v40  ;;  %v831_v49 = vmul.f32 -21.0, %v63_v32 }
  0x77   :  { %v446_v50 = vmul.f32 %v318_v42, %v62_v23  ;;  %v1086_v51 = vmul.f32 %v958_v43, %v62_v23  ;;  %v447_v52 = vmul.f32 %v319_v44, %v63_v32  ;;  %v192_v53 = vmul.f32 %v64_v45, %v64_v45 }
  0x78   :  { %v1783_v55 = vpop.eup %1782  ;;  %1595 = vst [vmem:[#allocation5 + $0x120] sm:$0xff] %v1467_v46  ;;  %v1341_v56 = vmul.f32 %v1213_v48, %v445_v34  ;;  %v959_v57 = vadd.f32 48.0, %v831_v49  ;;  %1790 = vrcp.f32 %v64_v45  ;;  %v832_v58 = vmul.f32 -21.0, %v64_v45  ;;  %v69_v34 = vld [vmem:[#allocation2 + $0x170] sm:$0xff] }
  0x79   :  { %v1468_v59 = vadd.f32 %v1783_v55, %v1340_v47  ;;  %v1214_v60 = vadd.f32 -28.0, %v1086_v51  ;;  %v320_v61 = vmul.f32 %v192_v53, %v192_v53  ;;  %v193_v62 = vmul.f32 %v65_v54, %v65_v54  ;;  %v70_v47 = vld [vmem:[#allocation2 + $0x178] sm:$0xff] }
  0x7a   :  { %v1785_v63 = vpop.eup %1784  ;;  %v1087_v0 = vmul.f32 %v959_v57, %v63_v32  ;;  %v960_v1 = vadd.f32 48.0, %v832_v58  ;;  %1792 = vrcp.f32 %v65_v54  ;;  %v833_v2 = vmul.f32 -21.0, %v65_v54 }
  0x7b   :  { %1596 = vst [vmem:[#allocation5 + $0x128] sm:$0xff] %v1468_v59  ;;  %v1469_v4 = vadd.f32 %v1785_v63, %v1341_v56  ;;  %v1342_v5 = vmul.f32 %v1214_v60, %v446_v50  ;;  %v448_v6 = vmul.f32 %v320_v61, %v64_v45  ;;  %v321_v7 = vmul.f32 %v193_v62, %v193_v62  ;;  %v71_v56 = vld [vmem:[#allocation2 + $0x180] sm:$0xff] }
  0x7c   :  { %v1215_v8 = vadd.f32 -28.0, %v1087_v0  ;;  %v1088_v9 = vmul.f32 %v960_v1, %v64_v45  ;;  %v961_v10 = vadd.f32 48.0, %v833_v2  ;;  %v194_v11 = vmul.f32 %v66_v3, %v66_v3 }
  0x7d   :  { %v1787_v13 = vpop.eup %1786  ;;  %1597 = vst [vmem:[#allocation5 + $0x130] sm:$0xff] %v1469_v4  ;;  %v449_v14 = vmul.f32 %v321_v7, %v65_v54  ;;  %1794 = vrcp.f32 %v66_v3  ;;  %v834_v15 = vmul.f32 -21.0, %v66_v3  ;;  %v195_v16 = vmul.f32 %v67_v12, %v67_v12 }
  0x7e   :  { %v1470_v17 = vadd.f32 %v1787_v13, %v1342_v5  ;;  %v1343_v18 = vmul.f32 %v1215_v8, %v447_v52  ;;  %v1216_v19 = vadd.f32 -28.0, %v1088_v9  ;;  %v1089_v20 = vmul.f32 %v961_v10, %v65_v54  ;;  %v72_v5 = vld [vmem:[#allocation2 + $0x188] sm:$0xff] }
  0x7f   :  { %v1789_v21 = vpop.eup %1788  ;;  %v322_v22 = vmul.f32 %v194_v11, %v194_v11  ;;  %v962_v23 = vadd.f32 48.0, %v834_v15  ;;  %v323_v24 = vmul.f32 %v195_v16, %v195_v16  ;;  %1796 = vrcp.f32 %v67_v12 }
  0x80   :  { %1598 = vst [vmem:[#allocation5 + $0x138] sm:$0xff] %v1470_v17  ;;  %v1471_v26 = vadd.f32 %v1789_v21, %v1343_v18  ;;  %v1344_v27 = vmul.f32 %v1216_v19, %v448_v6  ;;  %v1217_v28 = vadd.f32 -28.0, %v1089_v20  ;;  %v835_v29 = vmul.f32 -21.0, %v67_v12 }
  0x81   :  { %v450_v30 = vmul.f32 %v322_v22, %v66_v3  ;;  %v1090_v31 = vmul.f32 %v962_v23, %v66_v3  ;;  %v451_v32 = vmul.f32 %v323_v24, %v67_v12  ;;  %v196_v33 = vmul.f32 %v68_v25, %v68_v25 }
  0x82   :  { %v1791_v35 = vpop.eup %1790  ;;  %1599 = vst [vmem:[#allocation5 + $0x140] sm:$0xff] %v1471_v26  ;;  %v1345_v36 = vmul.f32 %v1217_v28, %v449_v14  ;;  %v963_v37 = vadd.f32 48.0, %v835_v29  ;;  %1798 = vrcp.f32 %v68_v25  ;;  %v836_v38 = vmul.f32 -21.0, %v68_v25  ;;  %v73_v14 = vld [vmem:[#allocation2 + $0x190] sm:$0xff] }
  0x83   :  { %v1472_v39 = vadd.f32 %v1791_v35, %v1344_v27  ;;  %v1218_v40 = vadd.f32 -28.0, %v1090_v31  ;;  %v324_v41 = vmul.f32 %v196_v33, %v196_v33  ;;  %v197_v42 = vmul.f32 %v69_v34, %v69_v34  ;;  %v74_v27 = vld [vmem:[#allocation2 + $0x198] sm:$0xff] }
  0x84   :  { %v1793_v43 = vpop.eup %1792  ;;  %v1091_v44 = vmul.f32 %v963_v37, %v67_v12  ;;  %v964_v45 = vadd.f32 48.0, %v836_v38  ;;  %1800 = vrcp.f32 %v69_v34  ;;  %v837_v46 = vmul.f32 -21.0, %v69_v34 }
  0x85   :  { %1600 = vst [vmem:[#allocation5 + $0x148] sm:$0xff] %v1472_v39  ;;  %v1473_v48 = vadd.f32 %v1793_v43, %v1345_v36  ;;  %v1346_v49 = vmul.f32 %v1218_v40, %v450_v30  ;;  %v452_v50 = vmul.f32 %v324_v41, %v68_v25  ;;  %v325_v51 = vmul.f32 %v197_v42, %v197_v42  ;;  %v75_v36 = vld [vmem:[#allocation2 + $0x1a0] sm:$0xff] }
  0x86   :  { %v1219_v52 = vadd.f32 -28.0, %v1091_v44  ;;  %v1092_v53 = vmul.f32 %v964_v45, %v68_v25  ;;  %v965_v54 = vadd.f32 48.0, %v837_v46  ;;  %v198_v55 = vmul.f32 %v70_v47, %v70_v47 }
  0x87   :  { %v1795_v57 = vpop.eup %1794  ;;  %1601 = vst [vmem:[#allocation5 + $0x150] sm:$0xff] %v1473_v48  ;;  %v453_v58 = vmul.f32 %v325_v51, %v69_v34  ;;  %1802 = vrcp.f32 %v70_v47  ;;  %v838_v59 = vmul.f32 -21.0, %v70_v47  ;;  %v199_v60 = vmul.f32 %v71_v56, %v71_v56 }
  0x88   :  { %v1474_v61 = vadd.f32 %v1795_v57, %v1346_v49  ;;  %v1347_v62 = vmul.f32 %v1219_v52, %v451_v32  ;;  %v1220_v63 = vadd.f32 -28.0, %v1092_v53  ;;  %v1093_v0 = vmul.f32 %v965_v54, %v69_v34  ;;  %v76_v49 = vld [vmem:[#allocation2 + $0x1a8] sm:$0xff] }
  0x89   :  { %v1797_v1 = vpop.eup %1796  ;;  %v326_v2 = vmul.f32 %v198_v55, %v198_v55  ;;  %v966_v3 = vadd.f32 48.0, %v838_v59  ;;  %v327_v4 = vmul.f32 %v199_v60, %v199_v60  ;;  %1804 = vrcp.f32 %v71_v56 }
  0x8a   :  { %1602 = vst [vmem:[#allocation5 + $0x158] sm:$0xff] %v1474_v61  ;;  %v1475_v6 = vadd.f32 %v1797_v1, %v1347_v62  ;;  %v1348_v7 = vmul.f32 %v1220_v63, %v452_v50  ;;  %v1221_v8 = vadd.f32 -28.0, %v1093_v0  ;;  %v839_v9 = vmul.f32 -21.0, %v71_v56 }
  0x8b   :  { %v454_v10 = vmul.f32 %v326_v2, %v70_v47  ;;  %v1094_v11 = vmul.f32 %v966_v3, %v70_v47  ;;  %v455_v12 = vmul.f32 %v327_v4, %v71_v56  ;;  %v200_v13 = vmul.f32 %v72_v5, %v72_v5 }
  0x8c   :  { %v1799_v15 = vpop.eup %1798  ;;  %1603 = vst [vmem:[#allocation5 + $0x160] sm:$0xff] %v1475_v6  ;;  %v1349_v16 = vmul.f32 %v1221_v8, %v453_v58  ;;  %v967_v17 = vadd.f32 48.0, %v839_v9  ;;  %1806 = vrcp.f32 %v72_v5  ;;  %v840_v18 = vmul.f32 -21.0, %v72_v5  ;;  %v77_v58 = vld [vmem:[#allocation2 + $0x1b0] sm:$0xff] }
  0x8d   :  { %v1476_v19 = vadd.f32 %v1799_v15, %v1348_v7  ;;  %v1222_v20 = vadd.f32 -28.0, %v1094_v11  ;;  %v328_v21 = vmul.f32 %v200_v13, %v200_v13  ;;  %v201_v22 = vmul.f32 %v73_v14, %v73_v14  ;;  %v78_v7 = vld [vmem:[#allocation2 + $0x1b8] sm:$0xff] }
  0x8e   :  { %v1801_v23 = vpop.eup %1800  ;;  %v1095_v24 = vmul.f32 %v967_v17, %v71_v56  ;;  %v968_v25 = vadd.f32 48.0, %v840_v18  ;;  %1808 = vrcp.f32 %v73_v14  ;;  %v841_v26 = vmul.f32 -21.0, %v73_v14 }
  0x8f   :  { %1604 = vst [vmem:[#allocation5 + $0x168] sm:$0xff] %v1476_v19  ;;  %v1477_v28 = vadd.f32 %v1801_v23, %v1349_v16  ;;  %v1350_v29 = vmul.f32 %v1222_v20, %v454_v10  ;;  %v456_v30 = vmul.f32 %v328_v21, %v72_v5  ;;  %v329_v31 = vmul.f32 %v201_v22, %v201_v22  ;;  %v79_v16 = vld [vmem:[#allocation2 + $0x1c0] sm:$0xff] }
  0x90   :  { %v1223_v32 = vadd.f32 -28.0, %v1095_v24  ;;  %v1096_v33 = vmul.f32 %v968_v25, %v72_v5  ;;  %v969_v34 = vadd.f32 48.0, %v841_v26  ;;  %v202_v35 = vmul.f32 %v74_v27, %v74_v27 }
  0x91   :  { %v1803_v37 = vpop.eup %1802  ;;  %1605 = vst [vmem:[#allocation5 + $0x170] sm:$0xff] %v1477_v28  ;;  %v457_v38 = vmul.f32 %v329_v31, %v73_v14  ;;  %1810 = vrcp.f32 %v74_v27  ;;  %v842_v39 = vmul.f32 -21.0, %v74_v27  ;;  %v203_v40 = vmul.f32 %v75_v36, %v75_v36 }
  0x92   :  { %v1478_v41 = vadd.f32 %v1803_v37, %v1350_v29  ;;  %v1351_v42 = vmul.f32 %v1223_v32, %v455_v12  ;;  %v1224_v43 = vadd.f32 -28.0, %v1096_v33  ;;  %v1097_v44 = vmul.f32 %v969_v34, %v73_v14  ;;  %v80_v29 = vld [vmem:[#allocation2 + $0x1c8] sm:$0xff] }
  0x93   :  { %v1805_v45 = vpop.eup %1804  ;;  %v330_v46 = vmul.f32 %v202_v35, %v202_v35  ;;  %v970_v47 = vadd.f32 48.0, %v842_v39  ;;  %v331_v48 = vmul.f32 %v203_v40, %v203_v40  ;;  %1812 = vrcp.f32 %v75_v36 }
  0x94   :  { %1606 = vst [vmem:[#allocation5 + $0x178] sm:$0xff] %v1478_v41  ;;  %v1479_v50 = vadd.f32 %v1805_v45, %v1351_v42  ;;  %v1352_v51 = vmul.f32 %v1224_v43, %v456_v30  ;;  %v1225_v52 = vadd.f32 -28.0, %v1097_v44  ;;  %v843_v53 = vmul.f32 -21.0, %v75_v36 }
  0x95   :  { %v458_v54 = vmul.f32 %v330_v46, %v74_v27  ;;  %v1098_v55 = vmul.f32 %v970_v47, %v74_v27  ;;  %v459_v56 = vmul.f32 %v331_v48, %v75_v36  ;;  %v204_v57 = vmul.f32 %v76_v49, %v76_v49 }
  0x96   :  { %v1807_v59 = vpop.eup %1806  ;;  %1607 = vst [vmem:[#allocation5 + $0x180] sm:$0xff] %v1479_v50  ;;  %v1353_v60 = vmul.f32 %v1225_v52, %v457_v38  ;;  %v971_v61 = vadd.f32 48.0, %v843_v53  ;;  %1814 = vrcp.f32 %v76_v49  ;;  %v844_v62 = vmul.f32 -21.0, %v76_v49  ;;  %v81_v38 = vld [vmem:[#allocation2 + $0x1d0] sm:$0xff] }
  0x97   :  { %v1480_v63 = vadd.f32 %v1807_v59, %v1352_v51  ;;  %v1226_v0 = vadd.f32 -28.0, %v1098_v55  ;;  %v332_v1 = vmul.f32 %v204_v57, %v204_v57  ;;  %v205_v2 = vmul.f32 %v77_v58, %v77_v58  ;;  %v82_v51 = vld [vmem:[#allocation2 + $0x1d8] sm:$0xff] }
  0x98   :  { %v1809_v3 = vpop.eup %1808  ;;  %v1099_v4 = vmul.f32 %v971_v61, %v75_v36  ;;  %v972_v5 = vadd.f32 48.0, %v844_v62  ;;  %1816 = vrcp.f32 %v77_v58  ;;  %v845_v6 = vmul.f32 -21.0, %v77_v58 }
  0x99   :  { %1608 = vst [vmem:[#allocation5 + $0x188] sm:$0xff] %v1480_v63  ;;  %v1481_v8 = vadd.f32 %v1809_v3, %v1353_v60  ;;  %v1354_v9 = vmul.f32 %v1226_v0, %v458_v54  ;;  %v460_v10 = vmul.f32 %v332_v1, %v76_v49  ;;  %v333_v11 = vmul.f32 %v205_v2, %v205_v2  ;;  %v83_v60 = vld [vmem:[#allocation2 + $0x1e0] sm:$0xff] }
  0x9a   :  { %v1227_v12 = vadd.f32 -28.0, %v1099_v4  ;;  %v1100_v13 = vmul.f32 %v972_v5, %v76_v49  ;;  %v973_v14 = vadd.f32 48.0, %v845_v6  ;;  %v206_v15 = vmul.f32 %v78_v7, %v78_v7 }
  0x9b   :  { %v1811_v17 = vpop.eup %1810  ;;  %1609 = vst [vmem:[#allocation5 + $0x190] sm:$0xff] %v1481_v8  ;;  %v461_v18 = vmul.f32 %v333_v11, %v77_v58  ;;  %1818 = vrcp.f32 %v78_v7  ;;  %v846_v19 = vmul.f32 -21.0, %v78_v7  ;;  %v207_v20 = vmul.f32 %v79_v16, %v79_v16 }
  0x9c   :  { %v1482_v21 = vadd.f32 %v1811_v17, %v1354_v9  ;;  %v1355_v22 = vmul.f32 %v1227_v12, %v459_v56  ;;  %v1228_v23 = vadd.f32 -28.0, %v1100_v13  ;;  %v1101_v24 = vmul.f32 %v973_v14, %v77_v58  ;;  %v84_v9 = vld [vmem:[#allocation2 + $0x1e8] sm:$0xff] }
  0x9d   :  { %v1813_v25 = vpop.eup %1812  ;;  %v334_v26 = vmul.f32 %v206_v15, %v206_v15  ;;  %v974_v27 = vadd.f32 48.0, %v846_v19  ;;  %v335_v28 = vmul.f32 %v207_v20, %v207_v20  ;;  %1820 = vrcp.f32 %v79_v16 }
  0x9e   :  { %1610 = vst [vmem:[#allocation5 + $0x198] sm:$0xff] %v1482_v21  ;;  %v1483_v30 = vadd.f32 %v1813_v25, %v1355_v22  ;;  %v1356_v31 = vmul.f32 %v1228_v23, %v460_v10  ;;  %v1229_v32 = vadd.f32 -28.0, %v1101_v24  ;;  %v847_v33 = vmul.f32 -21.0, %v79_v16 }
  0x9f   :  { %v462_v34 = vmul.f32 %v334_v26, %v78_v7  ;;  %v1102_v35 = vmul.f32 %v974_v27, %v78_v7  ;;  %v463_v36 = vmul.f32 %v335_v28, %v79_v16  ;;  %v208_v37 = vmul.f32 %v80_v29, %v80_v29 }
  0xa0   :  { %v1815_v39 = vpop.eup %1814  ;;  %1611 = vst [vmem:[#allocation5 + $0x1a0] sm:$0xff] %v1483_v30  ;;  %v1357_v40 = vmul.f32 %v1229_v32, %v461_v18  ;;  %v975_v41 = vadd.f32 48.0, %v847_v33  ;;  %1822 = vrcp.f32 %v80_v29  ;;  %v848_v42 = vmul.f32 -21.0, %v80_v29  ;;  %v85_v18 = vld [vmem:[#allocation2 + $0x1f0] sm:$0xff] }
  0xa1   :  { %v1484_v43 = vadd.f32 %v1815_v39, %v1356_v31  ;;  %v1230_v44 = vadd.f32 -28.0, %v1102_v35  ;;  %v336_v45 = vmul.f32 %v208_v37, %v208_v37  ;;  %v209_v46 = vmul.f32 %v81_v38, %v81_v38  ;;  %v86_v31 = vld [vmem:[#allocation2 + $0x1f8] sm:$0xff] }
  0xa2   :  { %v1817_v47 = vpop.eup %1816  ;;  %v1103_v48 = vmul.f32 %v975_v41, %v79_v16  ;;  %v976_v49 = vadd.f32 48.0, %v848_v42  ;;  %1824 = vrcp.f32 %v81_v38  ;;  %v849_v50 = vmul.f32 -21.0, %v81_v38 }
  0xa3   :  { %1612 = vst [vmem:[#allocation5 + $0x1a8] sm:$0xff] %v1484_v43  ;;  %v1485_v52 = vadd.f32 %v1817_v47, %v1357_v40  ;;  %v1358_v53 = vmul.f32 %v1230_v44, %v462_v34  ;;  %v464_v54 = vmul.f32 %v336_v45, %v80_v29  ;;  %v337_v55 = vmul.f32 %v209_v46, %v209_v46  ;;  %v87_v40 = vld [vmem:[#allocation2 + $0x200] sm:$0xff] }
  0xa4   :  { %v1231_v56 = vadd.f32 -28.0, %v1103_v48  ;;  %v1104_v57 = vmul.f32 %v976_v49, %v80_v29  ;;  %v977_v58 = vadd.f32 48.0, %v849_v50  ;;  %v210_v59 = vmul.f32 %v82_v51, %v82_v51 }
  0xa5   :  { %v1819_v61 = vpop.eup %1818  ;;  %1613 = vst [vmem:[#allocation5 + $0x1b0] sm:$0xff] %v1485_v52  ;;  %v465_v62 = vmul.f32 %v337_v55, %v81_v38  ;;  %1826 = vrcp.f32 %v82_v51  ;;  %v850_v63 = vmul.f32 -21.0, %v82_v51  ;;  %v211_v0 = vmul.f32 %v83_v60, %v83_v60 }
  0xa6   :  { %v1486_v1 = vadd.f32 %v1819_v61, %v1358_v53  ;;  %v1359_v2 = vmul.f32 %v1231_v56, %v463_v36  ;;  %v1232_v3 = vadd.f32 -28.0, %v1104_v57  ;;  %v1105_v4 = vmul.f32 %v977_v58, %v81_v38  ;;  %v88_v53 = vld [vmem:[#allocation2 + $0x208] sm:$0xff] }
  0xa7   :  { %v1821_v5 = vpop.eup %1820  ;;  %v338_v6 = vmul.f32 %v210_v59, %v210_v59  ;;  %v978_v7 = vadd.f32 48.0, %v850_v63  ;;  %v339_v8 = vmul.f32 %v211_v0, %v211_v0  ;;  %1828 = vrcp.f32 %v83_v60 }
  0xa8   :  { %1614 = vst [vmem:[#allocation5 + $0x1b8] sm:$0xff] %v1486_v1  ;;  %v1487_v10 = vadd.f32 %v1821_v5, %v1359_v2  ;;  %v1360_v11 = vmul.f32 %v1232_v3, %v464_v54  ;;  %v1233_v12 = vadd.f32 -28.0, %v1105_v4  ;;  %v851_v13 = vmul.f32 -21.0, %v83_v60 }
  0xa9   :  { %v466_v14 = vmul.f32 %v338_v6, %v82_v51  ;;  %v1106_v15 = vmul.f32 %v978_v7, %v82_v51  ;;  %v467_v16 = vmul.f32 %v339_v8, %v83_v60  ;;  %v212_v17 = vmul.f32 %v84_v9, %v84_v9 }
  0xaa   :  { %v1823_v19 = vpop.eup %1822  ;;  %1615 = vst [vmem:[#allocation5 + $0x1c0] sm:$0xff] %v1487_v10  ;;  %v1361_v20 = vmul.f32 %v1233_v12, %v465_v62  ;;  %v979_v21 = vadd.f32 48.0, %v851_v13  ;;  %1830 = vrcp.f32 %v84_v9  ;;  %v852_v22 = vmul.f32 -21.0, %v84_v9  ;;  %v89_v62 = vld [vmem:[#allocation2 + $0x210] sm:$0xff] }
  0xab   :  { %v1488_v23 = vadd.f32 %v1823_v19, %v1360_v11  ;;  %v1234_v24 = vadd.f32 -28.0, %v1106_v15  ;;  %v340_v25 = vmul.f32 %v212_v17, %v212_v17  ;;  %v213_v26 = vmul.f32 %v85_v18, %v85_v18  ;;  %v90_v11 = vld [vmem:[#allocation2 + $0x218] sm:$0xff] }
  0xac   :  { %v1825_v27 = vpop.eup %1824  ;;  %v1107_v28 = vmul.f32 %v979_v21, %v83_v60  ;;  %v980_v29 = vadd.f32 48.0, %v852_v22  ;;  %1832 = vrcp.f32 %v85_v18  ;;  %v853_v30 = vmul.f32 -21.0, %v85_v18 }
  0xad   :  { %1616 = vst [vmem:[#allocation5 + $0x1c8] sm:$0xff] %v1488_v23  ;;  %v1489_v32 = vadd.f32 %v1825_v27, %v1361_v20  ;;  %v1362_v33 = vmul.f32 %v1234_v24, %v466_v14  ;;  %v468_v34 = vmul.f32 %v340_v25, %v84_v9  ;;  %v341_v35 = vmul.f32 %v213_v26, %v213_v26  ;;  %v91_v20 = vld [vmem:[#allocation2 + $0x220] sm:$0xff] }
  0xae   :  { %v1235_v36 = vadd.f32 -28.0, %v1107_v28  ;;  %v1108_v37 = vmul.f32 %v980_v29, %v84_v9  ;;  %v981_v38 = vadd.f32 48.0, %v853_v30  ;;  %v214_v39 = vmul.f32 %v86_v31, %v86_v31 }
  0xaf   :  { %v1827_v41 = vpop.eup %1826  ;;  %1617 = vst [vmem:[#allocation5 + $0x1d0] sm:$0xff] %v1489_v32  ;;  %v469_v42 = vmul.f32 %v341_v35, %v85_v18  ;;  %1834 = vrcp.f32 %v86_v31  ;;  %v854_v43 = vmul.f32 -21.0, %v86_v31  ;;  %v215_v44 = vmul.f32 %v87_v40, %v87_v40 }
  0xb0   :  { %v1490_v45 = vadd.f32 %v1827_v41, %v1362_v33  ;;  %v1363_v46 = vmul.f32 %v1235_v36, %v467_v16  ;;  %v1236_v47 = vadd.f32 -28.0, %v1108_v37  ;;  %v1109_v48 = vmul.f32 %v981_v38, %v85_v18  ;;  %v92_v33 = vld [vmem:[#allocation2 + $0x228] sm:$0xff] }
  0xb1   :  { %v1829_v49 = vpop.eup %1828  ;;  %v342_v50 = vmul.f32 %v214_v39, %v214_v39  ;;  %v982_v51 = vadd.f32 48.0, %v854_v43  ;;  %v343_v52 = vmul.f32 %v215_v44, %v215_v44  ;;  %1836 = vrcp.f32 %v87_v40 }
  0xb2   :  { %1618 = vst [vmem:[#allocation5 + $0x1d8] sm:$0xff] %v1490_v45  ;;  %v1491_v54 = vadd.f32 %v1829_v49, %v1363_v46  ;;  %v1364_v55 = vmul.f32 %v1236_v47, %v468_v34  ;;  %v1237_v56 = vadd.f32 -28.0, %v1109_v48  ;;  %v855_v57 = vmul.f32 -21.0, %v87_v40 }
  0xb3   :  { %v470_v58 = vmul.f32 %v342_v50, %v86_v31  ;;  %v1110_v59 = vmul.f32 %v982_v51, %v86_v31  ;;  %v471_v60 = vmul.f32 %v343_v52, %v87_v40  ;;  %v216_v61 = vmul.f32 %v88_v53, %v88_v53 }
  0xb4   :  { %v1831_v63 = vpop.eup %1830  ;;  %1619 = vst [vmem:[#allocation5 + $0x1e0] sm:$0xff] %v1491_v54  ;;  %v1365_v0 = vmul.f32 %v1237_v56, %v469_v42  ;;  %v983_v1 = vadd.f32 48.0, %v855_v57  ;;  %1838 = vrcp.f32 %v88_v53  ;;  %v856_v2 = vmul.f32 -21.0, %v88_v53  ;;  %v93_v42 = vld [vmem:[#allocation2 + $0x230] sm:$0xff] }
  0xb5   :  { %v1492_v3 = vadd.f32 %v1831_v63, %v1364_v55  ;;  %v1238_v4 = vadd.f32 -28.0, %v1110_v59  ;;  %v344_v5 = vmul.f32 %v216_v61, %v216_v61  ;;  %v217_v6 = vmul.f32 %v89_v62, %v89_v62  ;;  %v94_v55 = vld [vmem:[#allocation2 + $0x238] sm:$0xff] }
  0xb6   :  { %v1833_v7 = vpop.eup %1832  ;;  %v1111_v8 = vmul.f32 %v983_v1, %v87_v40  ;;  %v984_v9 = vadd.f32 48.0, %v856_v2  ;;  %1840 = vrcp.f32 %v89_v62  ;;  %v857_v10 = vmul.f32 -21.0, %v89_v62 }
  0xb7   :  { %1620 = vst [vmem:[#allocation5 + $0x1e8] sm:$0xff] %v1492_v3  ;;  %v1493_v12 = vadd.f32 %v1833_v7, %v1365_v0  ;;  %v1366_v13 = vmul.f32 %v1238_v4, %v470_v58  ;;  %v472_v14 = vmul.f32 %v344_v5, %v88_v53  ;;  %v345_v15 = vmul.f32 %v217_v6, %v217_v6  ;;  %v95_v0 = vld [vmem:[#allocation2 + $0x240] sm:$0xff] }
  0xb8   :  { %v1239_v16 = vadd.f32 -28.0, %v1111_v8  ;;  %v1112_v17 = vmul.f32 %v984_v9, %v88_v53  ;;  %v985_v18 = vadd.f32 48.0, %v857_v10  ;;  %v218_v19 = vmul.f32 %v90_v11, %v90_v11 }
  0xb9   :  { %v1835_v21 = vpop.eup %1834  ;;  %1621 = vst [vmem:[#allocation5 + $0x1f0] sm:$0xff] %v1493_v12  ;;  %v473_v22 = vmul.f32 %v345_v15, %v89_v62  ;;  %1842 = vrcp.f32 %v90_v11  ;;  %v858_v23 = vmul.f32 -21.0, %v90_v11  ;;  %v219_v24 = vmul.f32 %v91_v20, %v91_v20 }
  0xba   :  { %v1494_v25 = vadd.f32 %v1835_v21, %v1366_v13  ;;  %v1367_v26 = vmul.f32 %v1239_v16, %v471_v60  ;;  %v1240_v27 = vadd.f32 -28.0, %v1112_v17  ;;  %v1113_v28 = vmul.f32 %v985_v18, %v89_v62  ;;  %v96_v13 = vld [vmem:[#allocation2 + $0x248] sm:$0xff] }
  0xbb   :  { %v1837_v29 = vpop.eup %1836  ;;  %v346_v30 = vmul.f32 %v218_v19, %v218_v19  ;;  %v986_v31 = vadd.f32 48.0, %v858_v23  ;;  %v347_v32 = vmul.f32 %v219_v24, %v219_v24  ;;  %1844 = vrcp.f32 %v91_v20 }
  0xbc   :  { %1622 = vst [vmem:[#allocation5 + $0x1f8] sm:$0xff] %v1494_v25  ;;  %v1495_v34 = vadd.f32 %v1837_v29, %v1367_v26  ;;  %v1368_v35 = vmul.f32 %v1240_v27, %v472_v14  ;;  %v1241_v36 = vadd.f32 -28.0, %v1113_v28  ;;  %v859_v37 = vmul.f32 -21.0, %v91_v20 }
  0xbd   :  { %v474_v38 = vmul.f32 %v346_v30, %v90_v11  ;;  %v1114_v39 = vmul.f32 %v986_v31, %v90_v11  ;;  %v475_v40 = vmul.f32 %v347_v32, %v91_v20  ;;  %v220_v41 = vmul.f32 %v92_v33, %v92_v33 }
  0xbe   :  { %v1839_v43 = vpop.eup %1838  ;;  %1623 = vst [vmem:[#allocation5 + $0x200] sm:$0xff] %v1495_v34  ;;  %v1369_v44 = vmul.f32 %v1241_v36, %v473_v22  ;;  %v987_v45 = vadd.f32 48.0, %v859_v37  ;;  %1846 = vrcp.f32 %v92_v33  ;;  %v860_v46 = vmul.f32 -21.0, %v92_v33  ;;  %v97_v22 = vld [vmem:[#allocation2 + $0x250] sm:$0xff] }
  0xbf   :  { %v1496_v47 = vadd.f32 %v1839_v43, %v1368_v35  ;;  %v1242_v48 = vadd.f32 -28.0, %v1114_v39  ;;  %v348_v49 = vmul.f32 %v220_v41, %v220_v41  ;;  %v221_v50 = vmul.f32 %v93_v42, %v93_v42  ;;  %v98_v35 = vld [vmem:[#allocation2 + $0x258] sm:$0xff] }
  0xc0   :  { %v1841_v51 = vpop.eup %1840  ;;  %v1115_v52 = vmul.f32 %v987_v45, %v91_v20  ;;  %v988_v53 = vadd.f32 48.0, %v860_v46  ;;  %1848 = vrcp.f32 %v93_v42  ;;  %v861_v54 = vmul.f32 -21.0, %v93_v42 }
  0xc1   :  { %1624 = vst [vmem:[#allocation5 + $0x208] sm:$0xff] %v1496_v47  ;;  %v1497_v56 = vadd.f32 %v1841_v51, %v1369_v44  ;;  %v1370_v57 = vmul.f32 %v1242_v48, %v474_v38  ;;  %v476_v58 = vmul.f32 %v348_v49, %v92_v33  ;;  %v349_v59 = vmul.f32 %v221_v50, %v221_v50  ;;  %v99_v44 = vld [vmem:[#allocation2 + $0x260] sm:$0xff] }
  0xc2   :  { %v1243_v60 = vadd.f32 -28.0, %v1115_v52  ;;  %v1116_v61 = vmul.f32 %v988_v53, %v92_v33  ;;  %v989_v62 = vadd.f32 48.0, %v861_v54  ;;  %v222_v63 = vmul.f32 %v94_v55, %v94_v55 }
  0xc3   :  { %v1843_v1 = vpop.eup %1842  ;;  %1625 = vst [vmem:[#allocation5 + $0x210] sm:$0xff] %v1497_v56  ;;  %v477_v2 = vmul.f32 %v349_v59, %v93_v42  ;;  %1850 = vrcp.f32 %v94_v55  ;;  %v862_v3 = vmul.f32 -21.0, %v94_v55  ;;  %v223_v4 = vmul.f32 %v95_v0, %v95_v0 }
  0xc4   :  { %v1498_v5 = vadd.f32 %v1843_v1, %v1370_v57  ;;  %v1371_v6 = vmul.f32 %v1243_v60, %v475_v40  ;;  %v1244_v7 = vadd.f32 -28.0, %v1116_v61  ;;  %v1117_v8 = vmul.f32 %v989_v62, %v93_v42  ;;  %v100_v57 = vld [vmem:[#allocation2 + $0x268] sm:$0xff] }
  0xc5   :  { %v1845_v9 = vpop.eup %1844  ;;  %v350_v10 = vmul.f32 %v222_v63, %v222_v63  ;;  %v990_v11 = vadd.f32 48.0, %v862_v3  ;;  %v351_v12 = vmul.f32 %v223_v4, %v223_v4  ;;  %1852 = vrcp.f32 %v95_v0 }
  0xc6   :  { %1626 = vst [vmem:[#allocation5 + $0x218] sm:$0xff] %v1498_v5  ;;  %v1499_v14 = vadd.f32 %v1845_v9, %v1371_v6  ;;  %v1372_v15 = vmul.f32 %v1244_v7, %v476_v58  ;;  %v1245_v16 = vadd.f32 -28.0, %v1117_v8  ;;  %v863_v17 = vmul.f32 -21.0, %v95_v0 }
  0xc7   :  { %v478_v18 = vmul.f32 %v350_v10, %v94_v55  ;;  %v1118_v19 = vmul.f32 %v990_v11, %v94_v55  ;;  %v479_v20 = vmul.f32 %v351_v12, %v95_v0  ;;  %v224_v21 = vmul.f32 %v96_v13, %v96_v13 }
  0xc8   :  { %v1847_v23 = vpop.eup %1846  ;;  %1627 = vst [vmem:[#allocation5 + $0x220] sm:$0xff] %v1499_v14  ;;  %v1373_v24 = vmul.f32 %v1245_v16, %v477_v2  ;;  %v991_v25 = vadd.f32 48.0, %v863_v17  ;;  %1854 = vrcp.f32 %v96_v13  ;;  %v864_v26 = vmul.f32 -21.0, %v96_v13  ;;  %v101_v2 = vld [vmem:[#allocation2 + $0x270] sm:$0xff] }
  0xc9   :  { %v1500_v27 = vadd.f32 %v1847_v23, %v1372_v15  ;;  %v1246_v28 = vadd.f32 -28.0, %v1118_v19  ;;  %v352_v29 = vmul.f32 %v224_v21, %v224_v21  ;;  %v225_v30 = vmul.f32 %v97_v22, %v97_v22  ;;  %v102_v15 = vld [vmem:[#allocation2 + $0x278] sm:$0xff] }
  0xca   :  { %v1849_v31 = vpop.eup %1848  ;;  %v1119_v32 = vmul.f32 %v991_v25, %v95_v0  ;;  %v992_v33 = vadd.f32 48.0, %v864_v26  ;;  %1856 = vrcp.f32 %v97_v22  ;;  %v865_v34 = vmul.f32 -21.0, %v97_v22 }
  0xcb   :  { %1628 = vst [vmem:[#allocation5 + $0x228] sm:$0xff] %v1500_v27  ;;  %v1501_v36 = vadd.f32 %v1849_v31, %v1373_v24  ;;  %v1374_v37 = vmul.f32 %v1246_v28, %v478_v18  ;;  %v480_v38 = vmul.f32 %v352_v29, %v96_v13  ;;  %v353_v39 = vmul.f32 %v225_v30, %v225_v30  ;;  %v103_v24 = vld [vmem:[#allocation2 + $0x280] sm:$0xff] }
  0xcc   :  { %v1247_v40 = vadd.f32 -28.0, %v1119_v32  ;;  %v1120_v41 = vmul.f32 %v992_v33, %v96_v13  ;;  %v993_v42 = vadd.f32 48.0, %v865_v34  ;;  %v226_v43 = vmul.f32 %v98_v35, %v98_v35 }
  0xcd   :  { %v1851_v45 = vpop.eup %1850  ;;  %1629 = vst [vmem:[#allocation5 + $0x230] sm:$0xff] %v1501_v36  ;;  %v481_v46 = vmul.f32 %v353_v39, %v97_v22  ;;  %1858 = vrcp.f32 %v98_v35  ;;  %v866_v47 = vmul.f32 -21.0, %v98_v35  ;;  %v227_v48 = vmul.f32 %v99_v44, %v99_v44 }
  0xce   :  { %v1502_v49 = vadd.f32 %v1851_v45, %v1374_v37  ;;  %v1375_v50 = vmul.f32 %v1247_v40, %v479_v20  ;;  %v1248_v51 = vadd.f32 -28.0, %v1120_v41  ;;  %v1121_v52 = vmul.f32 %v993_v42, %v97_v22  ;;  %v104_v37 = vld [vmem:[#allocation2 + $0x288] sm:$0xff] }
  0xcf   :  { %v1853_v53 = vpop.eup %1852  ;;  %v354_v54 = vmul.f32 %v226_v43, %v226_v43  ;;  %v994_v55 = vadd.f32 48.0, %v866_v47  ;;  %v355_v56 = vmul.f32 %v227_v48, %v227_v48  ;;  %1860 = vrcp.f32 %v99_v44 }
  0xd0   :  { %1630 = vst [vmem:[#allocation5 + $0x238] sm:$0xff] %v1502_v49  ;;  %v1503_v58 = vadd.f32 %v1853_v53, %v1375_v50  ;;  %v1376_v59 = vmul.f32 %v1248_v51, %v480_v38  ;;  %v1249_v60 = vadd.f32 -28.0, %v1121_v52  ;;  %v867_v61 = vmul.f32 -21.0, %v99_v44 }
  0xd1   :  { %v482_v62 = vmul.f32 %v354_v54, %v98_v35  ;;  %v1122_v63 = vmul.f32 %v994_v55, %v98_v35  ;;  %v483_v0 = vmul.f32 %v355_v56, %v99_v44  ;;  %v228_v1 = vmul.f32 %v100_v57, %v100_v57 }
  0xd2   :  { %v1855_v3 = vpop.eup %1854  ;;  %1631 = vst [vmem:[#allocation5 + $0x240] sm:$0xff] %v1503_v58  ;;  %v1377_v4 = vmul.f32 %v1249_v60, %v481_v46  ;;  %v995_v5 = vadd.f32 48.0, %v867_v61  ;;  %1862 = vrcp.f32 %v100_v57  ;;  %v868_v6 = vmul.f32 -21.0, %v100_v57  ;;  %v105_v46 = vld [vmem:[#allocation2 + $0x290] sm:$0xff] }
  0xd3   :  { %v1504_v7 = vadd.f32 %v1855_v3, %v1376_v59  ;;  %v1250_v8 = vadd.f32 -28.0, %v1122_v63  ;;  %v356_v9 = vmul.f32 %v228_v1, %v228_v1  ;;  %v229_v10 = vmul.f32 %v101_v2, %v101_v2  ;;  %v106_v59 = vld [vmem:[#allocation2 + $0x298] sm:$0xff] }
  0xd4   :  { %v1857_v11 = vpop.eup %1856  ;;  %v1123_v12 = vmul.f32 %v995_v5, %v99_v44  ;;  %v996_v13 = vadd.f32 48.0, %v868_v6  ;;  %1864 = vrcp.f32 %v101_v2  ;;  %v869_v14 = vmul.f32 -21.0, %v101_v2 }
  0xd5   :  { %1632 = vst [vmem:[#allocation5 + $0x248] sm:$0xff] %v1504_v7  ;;  %v1505_v16 = vadd.f32 %v1857_v11, %v1377_v4  ;;  %v1378_v17 = vmul.f32 %v1250_v8, %v482_v62  ;;  %v484_v18 = vmul.f32 %v356_v9, %v100_v57  ;;  %v357_v19 = vmul.f32 %v229_v10, %v229_v10  ;;  %v107_v4 = vld [vmem:[#allocation2 + $0x2a0] sm:$0xff] }
  0xd6   :  { %v1251_v20 = vadd.f32 -28.0, %v1123_v12  ;;  %v1124_v21 = vmul.f32 %v996_v13, %v100_v57  ;;  %v997_v22 = vadd.f32 48.0, %v869_v14  ;;  %v230_v23 = vmul.f32 %v102_v15, %v102_v15 }
  0xd7   :  { %v1859_v25 = vpop.eup %1858  ;;  %1633 = vst [vmem:[#allocation5 + $0x250] sm:$0xff] %v1505_v16  ;;  %v485_v26 = vmul.f32 %v357_v19, %v101_v2  ;;  %1866 = vrcp.f32 %v102_v15  ;;  %v870_v27 = vmul.f32 -21.0, %v102_v15  ;;  %v231_v28 = vmul.f32 %v103_v24, %v103_v24 }
  0xd8   :  { %v1506_v29 = vadd.f32 %v1859_v25, %v1378_v17  ;;  %v1379_v30 = vmul.f32 %v1251_v20, %v483_v0  ;;  %v1252_v31 = vadd.f32 -28.0, %v1124_v21  ;;  %v1125_v32 = vmul.f32 %v997_v22, %v101_v2  ;;  %v108_v17 = vld [vmem:[#allocation2 + $0x2a8] sm:$0xff] }
  0xd9   :  { %v1861_v33 = vpop.eup %1860  ;;  %v358_v34 = vmul.f32 %v230_v23, %v230_v23  ;;  %v998_v35 = vadd.f32 48.0, %v870_v27  ;;  %v359_v36 = vmul.f32 %v231_v28, %v231_v28  ;;  %1868 = vrcp.f32 %v103_v24 }
  0xda   :  { %1634 = vst [vmem:[#allocation5 + $0x258] sm:$0xff] %v1506_v29  ;;  %v1507_v38 = vadd.f32 %v1861_v33, %v1379_v30  ;;  %v1380_v39 = vmul.f32 %v1252_v31, %v484_v18  ;;  %v1253_v40 = vadd.f32 -28.0, %v1125_v32  ;;  %v871_v41 = vmul.f32 -21.0, %v103_v24 }
  0xdb   :  { %v486_v42 = vmul.f32 %v358_v34, %v102_v15  ;;  %v1126_v43 = vmul.f32 %v998_v35, %v102_v15  ;;  %v487_v44 = vmul.f32 %v359_v36, %v103_v24  ;;  %v232_v45 = vmul.f32 %v104_v37, %v104_v37 }
  0xdc   :  { %v1863_v47 = vpop.eup %1862  ;;  %1635 = vst [vmem:[#allocation5 + $0x260] sm:$0xff] %v1507_v38  ;;  %v1381_v48 = vmul.f32 %v1253_v40, %v485_v26  ;;  %v999_v49 = vadd.f32 48.0, %v871_v41  ;;  %1870 = vrcp.f32 %v104_v37  ;;  %v872_v50 = vmul.f32 -21.0, %v104_v37  ;;  %v109_v26 = vld [vmem:[#allocation2 + $0x2b0] sm:$0xff] }
  0xdd   :  { %v1508_v51 = vadd.f32 %v1863_v47, %v1380_v39  ;;  %v1254_v52 = vadd.f32 -28.0, %v1126_v43  ;;  %v360_v53 = vmul.f32 %v232_v45, %v232_v45  ;;  %v233_v54 = vmul.f32 %v105_v46, %v105_v46  ;;  %v110_v39 = vld [vmem:[#allocation2 + $0x2b8] sm:$0xff] }
  0xde   :  { %v1865_v55 = vpop.eup %1864  ;;  %v1127_v56 = vmul.f32 %v999_v49, %v103_v24  ;;  %v1000_v57 = vadd.f32 48.0, %v872_v50  ;;  %1872 = vrcp.f32 %v105_v46  ;;  %v873_v58 = vmul.f32 -21.0, %v105_v46 }
  0xdf   :  { %1636 = vst [vmem:[#allocation5 + $0x268] sm:$0xff] %v1508_v51  ;;  %v1509_v60 = vadd.f32 %v1865_v55, %v1381_v48  ;;  %v1382_v61 = vmul.f32 %v1254_v52, %v486_v42  ;;  %v488_v62 = vmul.f32 %v360_v53, %v104_v37  ;;  %v361_v63 = vmul.f32 %v233_v54, %v233_v54  ;;  %v111_v48 = vld [vmem:[#allocation2 + $0x2c0] sm:$0xff] }
  0xe0   :  { %v1255_v0 = vadd.f32 -28.0, %v1127_v56  ;;  %v1128_v1 = vmul.f32 %v1000_v57, %v104_v37  ;;  %v1001_v2 = vadd.f32 48.0, %v873_v58  ;;  %v234_v3 = vmul.f32 %v106_v59, %v106_v59 }
  0xe1   :  { %v1867_v5 = vpop.eup %1866  ;;  %1637 = vst [vmem:[#allocation5 + $0x270] sm:$0xff] %v1509_v60  ;;  %v489_v6 = vmul.f32 %v361_v63, %v105_v46  ;;  %1874 = vrcp.f32 %v106_v59  ;;  %v874_v7 = vmul.f32 -21.0, %v106_v59  ;;  %v235_v8 = vmul.f32 %v107_v4, %v107_v4 }
  0xe2   :  { %v1510_v9 = vadd.f32 %v1867_v5, %v1382_v61  ;;  %v1383_v10 = vmul.f32 %v1255_v0, %v487_v44  ;;  %v1256_v11 = vadd.f32 -28.0, %v1128_v1  ;;  %v1129_v12 = vmul.f32 %v1001_v2, %v105_v46  ;;  %v112_v61 = vld [vmem:[#allocation2 + $0x2c8] sm:$0xff] }
  0xe3   :  { %v1869_v13 = vpop.eup %1868  ;;  %v362_v14 = vmul.f32 %v234_v3, %v234_v3  ;;  %v1002_v15 = vadd.f32 48.0, %v874_v7  ;;  %v363_v16 = vmul.f32 %v235_v8, %v235_v8  ;;  %1876 = vrcp.f32 %v107_v4 }
  0xe4   :  { %1638 = vst [vmem:[#allocation5 + $0x278] sm:$0xff] %v1510_v9  ;;  %v1511_v18 = vadd.f32 %v1869_v13, %v1383_v10  ;;  %v1384_v19 = vmul.f32 %v1256_v11, %v488_v62  ;;  %v1257_v20 = vadd.f32 -28.0, %v1129_v12  ;;  %v875_v21 = vmul.f32 -21.0, %v107_v4 }
  0xe5   :  { %v490_v22 = vmul.f32 %v362_v14, %v106_v59  ;;  %v1130_v23 = vmul.f32 %v1002_v15, %v106_v59  ;;  %v491_v24 = vmul.f32 %v363_v16, %v107_v4  ;;  %v236_v25 = vmul.f32 %v108_v17, %v108_v17 }
  0xe6   :  { %v1871_v27 = vpop.eup %1870  ;;  %1639 = vst [vmem:[#allocation5 + $0x280] sm:$0xff] %v1511_v18  ;;  %v1385_v28 = vmul.f32 %v1257_v20, %v489_v6  ;;  %v1003_v29 = vadd.f32 48.0, %v875_v21  ;;  %1878 = vrcp.f32 %v108_v17  ;;  %v876_v30 = vmul.f32 -21.0, %v108_v17  ;;  %v113_v6 = vld [vmem:[#allocation2 + $0x2d0] sm:$0xff] }
  0xe7   :  { %v1512_v31 = vadd.f32 %v1871_v27, %v1384_v19  ;;  %v1258_v32 = vadd.f32 -28.0, %v1130_v23  ;;  %v364_v33 = vmul.f32 %v236_v25, %v236_v25  ;;  %v237_v34 = vmul.f32 %v109_v26, %v109_v26  ;;  %v114_v19 = vld [vmem:[#allocation2 + $0x2d8] sm:$0xff] }
  0xe8   :  { %v1873_v35 = vpop.eup %1872  ;;  %v1131_v36 = vmul.f32 %v1003_v29, %v107_v4  ;;  %v1004_v37 = vadd.f32 48.0, %v876_v30  ;;  %1880 = vrcp.f32 %v109_v26  ;;  %v877_v38 = vmul.f32 -21.0, %v109_v26 }
  0xe9   :  { %1640 = vst [vmem:[#allocation5 + $0x288] sm:$0xff] %v1512_v31  ;;  %v1513_v40 = vadd.f32 %v1873_v35, %v1385_v28  ;;  %v1386_v41 = vmul.f32 %v1258_v32, %v490_v22  ;;  %v492_v42 = vmul.f32 %v364_v33, %v108_v17  ;;  %v365_v43 = vmul.f32 %v237_v34, %v237_v34  ;;  %v115_v28 = vld [vmem:[#allocation2 + $0x2e0] sm:$0xff] }
  0xea   :  { %v1259_v44 = vadd.f32 -28.0, %v1131_v36  ;;  %v1132_v45 = vmul.f32 %v1004_v37, %v108_v17  ;;  %v1005_v46 = vadd.f32 48.0, %v877_v38  ;;  %v238_v47 = vmul.f32 %v110_v39, %v110_v39 }
  0xeb   :  { %v1875_v49 = vpop.eup %1874  ;;  %1641 = vst [vmem:[#allocation5 + $0x290] sm:$0xff] %v1513_v40  ;;  %v493_v50 = vmul.f32 %v365_v43, %v109_v26  ;;  %1882 = vrcp.f32 %v110_v39  ;;  %v878_v51 = vmul.f32 -21.0, %v110_v39  ;;  %v239_v52 = vmul.f32 %v111_v48, %v111_v48 }
  0xec   :  { %v1514_v53 = vadd.f32 %v1875_v49, %v1386_v41  ;;  %v1387_v54 = vmul.f32 %v1259_v44, %v491_v24  ;;  %v1260_v55 = vadd.f32 -28.0, %v1132_v45  ;;  %v1133_v56 = vmul.f32 %v1005_v46, %v109_v26  ;;  %v116_v41 = vld [vmem:[#allocation2 + $0x2e8] sm:$0xff] }
  0xed   :  { %v1877_v57 = vpop.eup %1876  ;;  %v366_v58 = vmul.f32 %v238_v47, %v238_v47  ;;  %v1006_v59 = vadd.f32 48.0, %v878_v51  ;;  %v367_v60 = vmul.f32 %v239_v52, %v239_v52  ;;  %1884 = vrcp.f32 %v111_v48 }
  0xee   :  { %1642 = vst [vmem:[#allocation5 + $0x298] sm:$0xff] %v1514_v53  ;;  %v1515_v62 = vadd.f32 %v1877_v57, %v1387_v54  ;;  %v1388_v63 = vmul.f32 %v1260_v55, %v492_v42  ;;  %v1261_v0 = vadd.f32 -28.0, %v1133_v56  ;;  %v879_v1 = vmul.f32 -21.0, %v111_v48 }
  0xef   :  { %v494_v2 = vmul.f32 %v366_v58, %v110_v39  ;;  %v1134_v3 = vmul.f32 %v1006_v59, %v110_v39  ;;  %v495_v4 = vmul.f32 %v367_v60, %v111_v48  ;;  %v240_v5 = vmul.f32 %v112_v61, %v112_v61 }
  0xf0   :  { %v1879_v7 = vpop.eup %1878  ;;  %1643 = vst [vmem:[#allocation5 + $0x2a0] sm:$0xff] %v1515_v62  ;;  %v1389_v8 = vmul.f32 %v1261_v0, %v493_v50  ;;  %v1007_v9 = vadd.f32 48.0, %v879_v1  ;;  %1886 = vrcp.f32 %v112_v61  ;;  %v880_v10 = vmul.f32 -21.0, %v112_v61  ;;  %v117_v50 = vld [vmem:[#allocation2 + $0x2f0] sm:$0xff] }
  0xf1   :  { %v1516_v11 = vadd.f32 %v1879_v7, %v1388_v63  ;;  %v1262_v12 = vadd.f32 -28.0, %v1134_v3  ;;  %v368_v13 = vmul.f32 %v240_v5, %v240_v5  ;;  %v241_v14 = vmul.f32 %v113_v6, %v113_v6  ;;  %v118_v63 = vld [vmem:[#allocation2 + $0x2f8] sm:$0xff] }
  0xf2   :  { %v1881_v15 = vpop.eup %1880  ;;  %v1135_v16 = vmul.f32 %v1007_v9, %v111_v48  ;;  %v1008_v17 = vadd.f32 48.0, %v880_v10  ;;  %1888 = vrcp.f32 %v113_v6  ;;  %v881_v18 = vmul.f32 -21.0, %v113_v6 }
  0xf3   :  { %1644 = vst [vmem:[#allocation5 + $0x2a8] sm:$0xff] %v1516_v11  ;;  %v1517_v20 = vadd.f32 %v1881_v15, %v1389_v8  ;;  %v1390_v21 = vmul.f32 %v1262_v12, %v494_v2  ;;  %v496_v22 = vmul.f32 %v368_v13, %v112_v61  ;;  %v369_v23 = vmul.f32 %v241_v14, %v241_v14  ;;  %v119_v8 = vld [vmem:[#allocation2 + $0x300] sm:$0xff] }
  0xf4   :  { %v1263_v24 = vadd.f32 -28.0, %v1135_v16  ;;  %v1136_v25 = vmul.f32 %v1008_v17, %v112_v61  ;;  %v1009_v26 = vadd.f32 48.0, %v881_v18  ;;  %v242_v27 = vmul.f32 %v114_v19, %v114_v19 }
  0xf5   :  { %v1883_v29 = vpop.eup %1882  ;;  %1645 = vst [vmem:[#allocation5 + $0x2b0] sm:$0xff] %v1517_v20  ;;  %v497_v30 = vmul.f32 %v369_v23, %v113_v6  ;;  %1890 = vrcp.f32 %v114_v19  ;;  %v882_v31 = vmul.f32 -21.0, %v114_v19  ;;  %v243_v32 = vmul.f32 %v115_v28, %v115_v28 }
  0xf6   :  { %v1518_v33 = vadd.f32 %v1883_v29, %v1390_v21  ;;  %v1391_v34 = vmul.f32 %v1263_v24, %v495_v4  ;;  %v1264_v35 = vadd.f32 -28.0, %v1136_v25  ;;  %v1137_v36 = vmul.f32 %v1009_v26, %v113_v6  ;;  %v120_v21 = vld [vmem:[#allocation2 + $0x308] sm:$0xff] }
  0xf7   :  { %v1885_v37 = vpop.eup %1884  ;;  %v370_v38 = vmul.f32 %v242_v27, %v242_v27  ;;  %v1010_v39 = vadd.f32 48.0, %v882_v31  ;;  %v371_v40 = vmul.f32 %v243_v32, %v243_v32  ;;  %1892 = vrcp.f32 %v115_v28 }
  0xf8   :  { %1646 = vst [vmem:[#allocation5 + $0x2b8] sm:$0xff] %v1518_v33  ;;  %v1519_v42 = vadd.f32 %v1885_v37, %v1391_v34  ;;  %v1392_v43 = vmul.f32 %v1264_v35, %v496_v22  ;;  %v1265_v44 = vadd.f32 -28.0, %v1137_v36  ;;  %v883_v45 = vmul.f32 -21.0, %v115_v28 }
  0xf9   :  { %v498_v46 = vmul.f32 %v370_v38, %v114_v19  ;;  %v1138_v47 = vmul.f32 %v1010_v39, %v114_v19  ;;  %v499_v48 = vmul.f32 %v371_v40, %v115_v28  ;;  %v244_v49 = vmul.f32 %v116_v41, %v116_v41 }
  0xfa   :  { %v1887_v51 = vpop.eup %1886  ;;  %1647 = vst [vmem:[#allocation5 + $0x2c0] sm:$0xff] %v1519_v42  ;;  %v1393_v52 = vmul.f32 %v1265_v44, %v497_v30  ;;  %v1011_v53 = vadd.f32 48.0, %v883_v45  ;;  %1894 = vrcp.f32 %v116_v41  ;;  %v884_v54 = vmul.f32 -21.0, %v116_v41  ;;  %v121_v30 = vld [vmem:[#allocation2 + $0x310] sm:$0xff] }
  0xfb   :  { %v1520_v55 = vadd.f32 %v1887_v51, %v1392_v43  ;;  %v1266_v56 = vadd.f32 -28.0, %v1138_v47  ;;  %v372_v57 = vmul.f32 %v244_v49, %v244_v49  ;;  %v245_v58 = vmul.f32 %v117_v50, %v117_v50  ;;  %v122_v43 = vld [vmem:[#allocation2 + $0x318] sm:$0xff] }
  0xfc   :  { %v1889_v59 = vpop.eup %1888  ;;  %v1139_v60 = vmul.f32 %v1011_v53, %v115_v28  ;;  %v1012_v61 = vadd.f32 48.0, %v884_v54  ;;  %1896 = vrcp.f32 %v117_v50  ;;  %v885_v62 = vmul.f32 -21.0, %v117_v50 }
  0xfd   :  { %1648 = vst [vmem:[#allocation5 + $0x2c8] sm:$0xff] %v1520_v55  ;;  %v1521_v0 = vadd.f32 %v1889_v59, %v1393_v52  ;;  %v1394_v1 = vmul.f32 %v1266_v56, %v498_v46  ;;  %v500_v2 = vmul.f32 %v372_v57, %v116_v41  ;;  %v373_v3 = vmul.f32 %v245_v58, %v245_v58  ;;  %v123_v52 = vld [vmem:[#allocation2 + $0x320] sm:$0xff] }
  0xfe   :  { %v1267_v4 = vadd.f32 -28.0, %v1139_v60  ;;  %v1140_v5 = vmul.f32 %v1012_v61, %v116_v41  ;;  %v1013_v6 = vadd.f32 48.0, %v885_v62  ;;  %v246_v7 = vmul.f32 %v118_v63, %v118_v63 }
  0xff   :  { %v1891_v9 = vpop.eup %1890  ;;  %1649 = vst [vmem:[#allocation5 + $0x2d0] sm:$0xff] %v1521_v0  ;;  %v501_v10 = vmul.f32 %v373_v3, %v117_v50  ;;  %1898 = vrcp.f32 %v118_v63  ;;  %v886_v11 = vmul.f32 -21.0, %v118_v63  ;;  %v247_v12 = vmul.f32 %v119_v8, %v119_v8 }
 0x100   :  { %v1522_v13 = vadd.f32 %v1891_v9, %v1394_v1  ;;  %v1395_v14 = vmul.f32 %v1267_v4, %v499_v48  ;;  %v1268_v15 = vadd.f32 -28.0, %v1140_v5  ;;  %v1141_v16 = vmul.f32 %v1013_v6, %v117_v50  ;;  %v124_v1 = vld [vmem:[#allocation2 + $0x328] sm:$0xff] }
 0x101   :  { %v1893_v17 = vpop.eup %1892  ;;  %v374_v18 = vmul.f32 %v246_v7, %v246_v7  ;;  %v1014_v19 = vadd.f32 48.0, %v886_v11  ;;  %v375_v20 = vmul.f32 %v247_v12, %v247_v12  ;;  %1900 = vrcp.f32 %v119_v8 }
 0x102   :  { %1650 = vst [vmem:[#allocation5 + $0x2d8] sm:$0xff] %v1522_v13  ;;  %v1523_v22 = vadd.f32 %v1893_v17, %v1395_v14  ;;  %v1396_v23 = vmul.f32 %v1268_v15, %v500_v2  ;;  %v1269_v24 = vadd.f32 -28.0, %v1141_v16  ;;  %v887_v25 = vmul.f32 -21.0, %v119_v8 }
 0x103   :  { %v502_v26 = vmul.f32 %v374_v18, %v118_v63  ;;  %v1142_v27 = vmul.f32 %v1014_v19, %v118_v63  ;;  %v503_v28 = vmul.f32 %v375_v20, %v119_v8  ;;  %v248_v29 = vmul.f32 %v120_v21, %v120_v21 }
 0x104   :  { %v1895_v31 = vpop.eup %1894  ;;  %1651 = vst [vmem:[#allocation5 + $0x2e0] sm:$0xff] %v1523_v22  ;;  %v1397_v32 = vmul.f32 %v1269_v24, %v501_v10  ;;  %v1015_v33 = vadd.f32 48.0, %v887_v25  ;;  %1902 = vrcp.f32 %v120_v21  ;;  %v888_v34 = vmul.f32 -21.0, %v120_v21  ;;  %v125_v10 = vld [vmem:[#allocation2 + $0x330] sm:$0xff] }
 0x105   :  { %v1524_v35 = vadd.f32 %v1895_v31, %v1396_v23  ;;  %v1270_v36 = vadd.f32 -28.0, %v1142_v27  ;;  %v376_v37 = vmul.f32 %v248_v29, %v248_v29  ;;  %v249_v38 = vmul.f32 %v121_v30, %v121_v30  ;;  %v126_v23 = vld [vmem:[#allocation2 + $0x338] sm:$0xff] }
 0x106   :  { %v1897_v39 = vpop.eup %1896  ;;  %v1143_v40 = vmul.f32 %v1015_v33, %v119_v8  ;;  %v1016_v41 = vadd.f32 48.0, %v888_v34  ;;  %1904 = vrcp.f32 %v121_v30  ;;  %v889_v42 = vmul.f32 -21.0, %v121_v30 }
 0x107   :  { %1652 = vst [vmem:[#allocation5 + $0x2e8] sm:$0xff] %v1524_v35  ;;  %v1525_v44 = vadd.f32 %v1897_v39, %v1397_v32  ;;  %v1398_v45 = vmul.f32 %v1270_v36, %v502_v26  ;;  %v504_v46 = vmul.f32 %v376_v37, %v120_v21  ;;  %v377_v47 = vmul.f32 %v249_v38, %v249_v38  ;;  %v127_v32 = vld [vmem:[#allocation2 + $0x340] sm:$0xff] }
 0x108   :  { %v1271_v48 = vadd.f32 -28.0, %v1143_v40  ;;  %v1144_v49 = vmul.f32 %v1016_v41, %v120_v21  ;;  %v1017_v50 = vadd.f32 48.0, %v889_v42  ;;  %v250_v51 = vmul.f32 %v122_v43, %v122_v43 }
 0x109   :  { %v1899_v53 = vpop.eup %1898  ;;  %1653 = vst [vmem:[#allocation5 + $0x2f0] sm:$0xff] %v1525_v44  ;;  %v505_v54 = vmul.f32 %v377_v47, %v121_v30  ;;  %1906 = vrcp.f32 %v122_v43  ;;  %v890_v55 = vmul.f32 -21.0, %v122_v43  ;;  %v251_v56 = vmul.f32 %v123_v52, %v123_v52 }
 0x10a   :  { %v1526_v57 = vadd.f32 %v1899_v53, %v1398_v45  ;;  %v1399_v58 = vmul.f32 %v1271_v48, %v503_v28  ;;  %v1272_v59 = vadd.f32 -28.0, %v1144_v49  ;;  %v1145_v60 = vmul.f32 %v1017_v50, %v121_v30  ;;  %v128_v45 = vld [vmem:[#allocation2 + $0x348] sm:$0xff] }
 0x10b   :  { %v1901_v61 = vpop.eup %1900  ;;  %v378_v62 = vmul.f32 %v250_v51, %v250_v51  ;;  %v1018_v63 = vadd.f32 48.0, %v890_v55  ;;  %v379_v0 = vmul.f32 %v251_v56, %v251_v56  ;;  %1908 = vrcp.f32 %v123_v52 }
 0x10c   :  { %1654 = vst [vmem:[#allocation5 + $0x2f8] sm:$0xff] %v1526_v57  ;;  %v1527_v2 = vadd.f32 %v1901_v61, %v1399_v58  ;;  %v1400_v3 = vmul.f32 %v1272_v59, %v504_v46  ;;  %v1273_v4 = vadd.f32 -28.0, %v1145_v60  ;;  %v891_v5 = vmul.f32 -21.0, %v123_v52 }
 0x10d   :  { %v506_v6 = vmul.f32 %v378_v62, %v122_v43  ;;  %v1146_v7 = vmul.f32 %v1018_v63, %v122_v43  ;;  %v507_v8 = vmul.f32 %v379_v0, %v123_v52  ;;  %v252_v9 = vmul.f32 %v124_v1, %v124_v1 }
 0x10e   :  { %v1903_v11 = vpop.eup %1902  ;;  %1655 = vst [vmem:[#allocation5 + $0x300] sm:$0xff] %v1527_v2  ;;  %v1401_v12 = vmul.f32 %v1273_v4, %v505_v54  ;;  %v1019_v13 = vadd.f32 48.0, %v891_v5  ;;  %1910 = vrcp.f32 %v124_v1  ;;  %v892_v14 = vmul.f32 -21.0, %v124_v1  ;;  %v129_v54 = vld [vmem:[#allocation2 + $0x350] sm:$0xff] }
 0x10f   :  { %v1528_v15 = vadd.f32 %v1903_v11, %v1400_v3  ;;  %v1274_v16 = vadd.f32 -28.0, %v1146_v7  ;;  %v380_v17 = vmul.f32 %v252_v9, %v252_v9  ;;  %v253_v18 = vmul.f32 %v125_v10, %v125_v10  ;;  %v130_v3 = vld [vmem:[#allocation2 + $0x358] sm:$0xff] }
 0x110   :  { %v1905_v19 = vpop.eup %1904  ;;  %v1147_v20 = vmul.f32 %v1019_v13, %v123_v52  ;;  %v1020_v21 = vadd.f32 48.0, %v892_v14  ;;  %1912 = vrcp.f32 %v125_v10  ;;  %v893_v22 = vmul.f32 -21.0, %v125_v10 }
 0x111   :  { %1656 = vst [vmem:[#allocation5 + $0x308] sm:$0xff] %v1528_v15  ;;  %v1529_v24 = vadd.f32 %v1905_v19, %v1401_v12  ;;  %v1402_v25 = vmul.f32 %v1274_v16, %v506_v6  ;;  %v508_v26 = vmul.f32 %v380_v17, %v124_v1  ;;  %v381_v27 = vmul.f32 %v253_v18, %v253_v18  ;;  %v131_v12 = vld [vmem:[#allocation2 + $0x360] sm:$0xff] }
 0x112   :  { %v1275_v28 = vadd.f32 -28.0, %v1147_v20  ;;  %v1148_v29 = vmul.f32 %v1020_v21, %v124_v1  ;;  %v1021_v30 = vadd.f32 48.0, %v893_v22  ;;  %v254_v31 = vmul.f32 %v126_v23, %v126_v23 }
 0x113   :  { %v1907_v33 = vpop.eup %1906  ;;  %1657 = vst [vmem:[#allocation5 + $0x310] sm:$0xff] %v1529_v24  ;;  %v509_v34 = vmul.f32 %v381_v27, %v125_v10  ;;  %1914 = vrcp.f32 %v126_v23  ;;  %v894_v35 = vmul.f32 -21.0, %v126_v23  ;;  %v255_v36 = vmul.f32 %v127_v32, %v127_v32 }
 0x114   :  { %v1530_v37 = vadd.f32 %v1907_v33, %v1402_v25  ;;  %v1403_v38 = vmul.f32 %v1275_v28, %v507_v8  ;;  %v1276_v39 = vadd.f32 -28.0, %v1148_v29  ;;  %v1149_v40 = vmul.f32 %v1021_v30, %v125_v10  ;;  %v132_v25 = vld [vmem:[#allocation2 + $0x368] sm:$0xff] }
 0x115   :  { %v1909_v41 = vpop.eup %1908  ;;  %v382_v42 = vmul.f32 %v254_v31, %v254_v31  ;;  %v1022_v43 = vadd.f32 48.0, %v894_v35  ;;  %v383_v44 = vmul.f32 %v255_v36, %v255_v36  ;;  %1916 = vrcp.f32 %v127_v32 }
 0x116   :  { %1658 = vst [vmem:[#allocation5 + $0x318] sm:$0xff] %v1530_v37  ;;  %v1531_v46 = vadd.f32 %v1909_v41, %v1403_v38  ;;  %v1404_v47 = vmul.f32 %v1276_v39, %v508_v26  ;;  %v1277_v48 = vadd.f32 -28.0, %v1149_v40  ;;  %v895_v49 = vmul.f32 -21.0, %v127_v32 }
 0x117   :  { %v510_v50 = vmul.f32 %v382_v42, %v126_v23  ;;  %v1150_v51 = vmul.f32 %v1022_v43, %v126_v23  ;;  %v511_v52 = vmul.f32 %v383_v44, %v127_v32  ;;  %v256_v53 = vmul.f32 %v128_v45, %v128_v45 }
 0x118   :  { %v1911_v55 = vpop.eup %1910  ;;  %1659 = vst [vmem:[#allocation5 + $0x320] sm:$0xff] %v1531_v46  ;;  %v1405_v56 = vmul.f32 %v1277_v48, %v509_v34  ;;  %v1023_v57 = vadd.f32 48.0, %v895_v49  ;;  %1918 = vrcp.f32 %v128_v45  ;;  %v896_v58 = vmul.f32 -21.0, %v128_v45  ;;  %v133_v34 = vld [vmem:[#allocation2 + $0x370] sm:$0xff] }
 0x119   :  { %v1532_v59 = vadd.f32 %v1911_v55, %v1404_v47  ;;  %v1278_v60 = vadd.f32 -28.0, %v1150_v51  ;;  %v384_v61 = vmul.f32 %v256_v53, %v256_v53  ;;  %v257_v62 = vmul.f32 %v129_v54, %v129_v54  ;;  %v134_v47 = vld [vmem:[#allocation2 + $0x378] sm:$0xff] }
 0x11a   :  { %v1913_v63 = vpop.eup %1912  ;;  %v1151_v0 = vmul.f32 %v1023_v57, %v127_v32  ;;  %v1024_v1 = vadd.f32 48.0, %v896_v58  ;;  %1920 = vrcp.f32 %v129_v54  ;;  %v897_v2 = vmul.f32 -21.0, %v129_v54 }
 0x11b   :  { %1660 = vst [vmem:[#allocation5 + $0x328] sm:$0xff] %v1532_v59  ;;  %v1533_v4 = vadd.f32 %v1913_v63, %v1405_v56  ;;  %v1406_v5 = vmul.f32 %v1278_v60, %v510_v50  ;;  %v512_v6 = vmul.f32 %v384_v61, %v128_v45  ;;  %v385_v7 = vmul.f32 %v257_v62, %v257_v62  ;;  %v135_v56 = vld [vmem:[#allocation2 + $0x380] sm:$0xff] }
 0x11c   :  { %v1279_v8 = vadd.f32 -28.0, %v1151_v0  ;;  %v1152_v9 = vmul.f32 %v1024_v1, %v128_v45  ;;  %v1025_v10 = vadd.f32 48.0, %v897_v2  ;;  %v258_v11 = vmul.f32 %v130_v3, %v130_v3 }
 0x11d   :  { %v1915_v13 = vpop.eup %1914  ;;  %1661 = vst [vmem:[#allocation5 + $0x330] sm:$0xff] %v1533_v4  ;;  %v513_v14 = vmul.f32 %v385_v7, %v129_v54  ;;  %1922 = vrcp.f32 %v130_v3  ;;  %v898_v15 = vmul.f32 -21.0, %v130_v3  ;;  %v259_v16 = vmul.f32 %v131_v12, %v131_v12 }
 0x11e   :  { %v1534_v17 = vadd.f32 %v1915_v13, %v1406_v5  ;;  %v1407_v18 = vmul.f32 %v1279_v8, %v511_v52  ;;  %v1280_v19 = vadd.f32 -28.0, %v1152_v9  ;;  %v1153_v20 = vmul.f32 %v1025_v10, %v129_v54  ;;  %v136_v5 = vld [vmem:[#allocation2 + $0x388] sm:$0xff] }
 0x11f   :  { %v1917_v21 = vpop.eup %1916  ;;  %v386_v22 = vmul.f32 %v258_v11, %v258_v11  ;;  %v1026_v23 = vadd.f32 48.0, %v898_v15  ;;  %v387_v24 = vmul.f32 %v259_v16, %v259_v16  ;;  %1924 = vrcp.f32 %v131_v12 }
 0x120   :  { %1662 = vst [vmem:[#allocation5 + $0x338] sm:$0xff] %v1534_v17  ;;  %v1535_v26 = vadd.f32 %v1917_v21, %v1407_v18  ;;  %v1408_v27 = vmul.f32 %v1280_v19, %v512_v6  ;;  %v1281_v28 = vadd.f32 -28.0, %v1153_v20  ;;  %v899_v29 = vmul.f32 -21.0, %v131_v12 }
 0x121   :  { %v514_v30 = vmul.f32 %v386_v22, %v130_v3  ;;  %v1154_v31 = vmul.f32 %v1026_v23, %v130_v3  ;;  %v515_v32 = vmul.f32 %v387_v24, %v131_v12  ;;  %v260_v33 = vmul.f32 %v132_v25, %v132_v25 }
 0x122   :  { %v1919_v35 = vpop.eup %1918  ;;  %1663 = vst [vmem:[#allocation5 + $0x340] sm:$0xff] %v1535_v26  ;;  %v1409_v36 = vmul.f32 %v1281_v28, %v513_v14  ;;  %v1027_v37 = vadd.f32 48.0, %v899_v29  ;;  %1926 = vrcp.f32 %v132_v25  ;;  %v900_v38 = vmul.f32 -21.0, %v132_v25  ;;  %v137_v14 = vld [vmem:[#allocation2 + $0x390] sm:$0xff] }
 0x123   :  { %v1536_v39 = vadd.f32 %v1919_v35, %v1408_v27  ;;  %v1282_v40 = vadd.f32 -28.0, %v1154_v31  ;;  %v388_v41 = vmul.f32 %v260_v33, %v260_v33  ;;  %v261_v42 = vmul.f32 %v133_v34, %v133_v34  ;;  %v138_v27 = vld [vmem:[#allocation2 + $0x398] sm:$0xff] }
 0x124   :  { %v1921_v43 = vpop.eup %1920  ;;  %v1155_v44 = vmul.f32 %v1027_v37, %v131_v12  ;;  %v1028_v45 = vadd.f32 48.0, %v900_v38  ;;  %1928 = vrcp.f32 %v133_v34  ;;  %v901_v46 = vmul.f32 -21.0, %v133_v34 }
 0x125   :  { %1664 = vst [vmem:[#allocation5 + $0x348] sm:$0xff] %v1536_v39  ;;  %v1537_v48 = vadd.f32 %v1921_v43, %v1409_v36  ;;  %v1410_v49 = vmul.f32 %v1282_v40, %v514_v30  ;;  %v516_v50 = vmul.f32 %v388_v41, %v132_v25  ;;  %v389_v51 = vmul.f32 %v261_v42, %v261_v42  ;;  %v139_v36 = vld [vmem:[#allocation2 + $0x3a0] sm:$0xff] }
 0x126   :  { %v1283_v52 = vadd.f32 -28.0, %v1155_v44  ;;  %v1156_v53 = vmul.f32 %v1028_v45, %v132_v25  ;;  %v1029_v54 = vadd.f32 48.0, %v901_v46  ;;  %v262_v55 = vmul.f32 %v134_v47, %v134_v47 }
 0x127   :  { %v1923_v57 = vpop.eup %1922  ;;  %1665 = vst [vmem:[#allocation5 + $0x350] sm:$0xff] %v1537_v48  ;;  %v517_v58 = vmul.f32 %v389_v51, %v133_v34  ;;  %1930 = vrcp.f32 %v134_v47  ;;  %v902_v59 = vmul.f32 -21.0, %v134_v47  ;;  %v263_v60 = vmul.f32 %v135_v56, %v135_v56 }
 0x128   :  { %v1538_v61 = vadd.f32 %v1923_v57, %v1410_v49  ;;  %v1411_v62 = vmul.f32 %v1283_v52, %v515_v32  ;;  %v1284_v63 = vadd.f32 -28.0, %v1156_v53  ;;  %v1157_v0 = vmul.f32 %v1029_v54, %v133_v34  ;;  %v140_v49 = vld [vmem:[#allocation2 + $0x3a8] sm:$0xff] }
 0x129   :  { %v1925_v1 = vpop.eup %1924  ;;  %v390_v2 = vmul.f32 %v262_v55, %v262_v55  ;;  %v1030_v3 = vadd.f32 48.0, %v902_v59  ;;  %v391_v4 = vmul.f32 %v263_v60, %v263_v60  ;;  %1932 = vrcp.f32 %v135_v56 }
 0x12a   :  { %1666 = vst [vmem:[#allocation5 + $0x358] sm:$0xff] %v1538_v61  ;;  %v1539_v6 = vadd.f32 %v1925_v1, %v1411_v62  ;;  %v1412_v7 = vmul.f32 %v1284_v63, %v516_v50  ;;  %v1285_v8 = vadd.f32 -28.0, %v1157_v0  ;;  %v903_v9 = vmul.f32 -21.0, %v135_v56 }
 0x12b   :  { %v518_v10 = vmul.f32 %v390_v2, %v134_v47  ;;  %v1158_v11 = vmul.f32 %v1030_v3, %v134_v47  ;;  %v519_v12 = vmul.f32 %v391_v4, %v135_v56  ;;  %v264_v13 = vmul.f32 %v136_v5, %v136_v5 }
 0x12c   :  { %v1927_v15 = vpop.eup %1926  ;;  %1667 = vst [vmem:[#allocation5 + $0x360] sm:$0xff] %v1539_v6  ;;  %v1413_v16 = vmul.f32 %v1285_v8, %v517_v58  ;;  %v1031_v17 = vadd.f32 48.0, %v903_v9  ;;  %1934 = vrcp.f32 %v136_v5  ;;  %v904_v18 = vmul.f32 -21.0, %v136_v5  ;;  %v141_v58 = vld [vmem:[#allocation2 + $0x3b0] sm:$0xff] }
 0x12d   :  { %v1540_v19 = vadd.f32 %v1927_v15, %v1412_v7  ;;  %v1286_v20 = vadd.f32 -28.0, %v1158_v11  ;;  %v392_v21 = vmul.f32 %v264_v13, %v264_v13  ;;  %v265_v22 = vmul.f32 %v137_v14, %v137_v14  ;;  %v142_v7 = vld [vmem:[#allocation2 + $0x3b8] sm:$0xff] }
 0x12e   :  { %v1929_v23 = vpop.eup %1928  ;;  %v1159_v24 = vmul.f32 %v1031_v17, %v135_v56  ;;  %v1032_v25 = vadd.f32 48.0, %v904_v18  ;;  %1936 = vrcp.f32 %v137_v14  ;;  %v905_v26 = vmul.f32 -21.0, %v137_v14 }
 0x12f   :  { %1668 = vst [vmem:[#allocation5 + $0x368] sm:$0xff] %v1540_v19  ;;  %v1541_v28 = vadd.f32 %v1929_v23, %v1413_v16  ;;  %v1414_v29 = vmul.f32 %v1286_v20, %v518_v10  ;;  %v520_v30 = vmul.f32 %v392_v21, %v136_v5  ;;  %v393_v31 = vmul.f32 %v265_v22, %v265_v22  ;;  %v143_v16 = vld [vmem:[#allocation2 + $0x3c0] sm:$0xff] }
 0x130   :  { %v1287_v32 = vadd.f32 -28.0, %v1159_v24  ;;  %v1160_v33 = vmul.f32 %v1032_v25, %v136_v5  ;;  %v1033_v34 = vadd.f32 48.0, %v905_v26  ;;  %v266_v35 = vmul.f32 %v138_v27, %v138_v27 }
 0x131   :  { %v1931_v37 = vpop.eup %1930  ;;  %1669 = vst [vmem:[#allocation5 + $0x370] sm:$0xff] %v1541_v28  ;;  %v521_v38 = vmul.f32 %v393_v31, %v137_v14  ;;  %1938 = vrcp.f32 %v138_v27  ;;  %v906_v39 = vmul.f32 -21.0, %v138_v27  ;;  %v267_v40 = vmul.f32 %v139_v36, %v139_v36 }
 0x132   :  { %v1542_v41 = vadd.f32 %v1931_v37, %v1414_v29  ;;  %v1415_v42 = vmul.f32 %v1287_v32, %v519_v12  ;;  %v1288_v43 = vadd.f32 -28.0, %v1160_v33  ;;  %v1161_v44 = vmul.f32 %v1033_v34, %v137_v14  ;;  %v144_v29 = vld [vmem:[#allocation2 + $0x3c8] sm:$0xff] }
 0x133   :  { %v1933_v45 = vpop.eup %1932  ;;  %v394_v46 = vmul.f32 %v266_v35, %v266_v35  ;;  %v1034_v47 = vadd.f32 48.0, %v906_v39  ;;  %v395_v48 = vmul.f32 %v267_v40, %v267_v40  ;;  %1940 = vrcp.f32 %v139_v36 }
 0x134   :  { %1670 = vst [vmem:[#allocation5 + $0x378] sm:$0xff] %v1542_v41  ;;  %v1543_v50 = vadd.f32 %v1933_v45, %v1415_v42  ;;  %v1416_v51 = vmul.f32 %v1288_v43, %v520_v30  ;;  %v1289_v52 = vadd.f32 -28.0, %v1161_v44  ;;  %v907_v53 = vmul.f32 -21.0, %v139_v36 }
 0x135   :  { %v522_v54 = vmul.f32 %v394_v46, %v138_v27  ;;  %v1162_v55 = vmul.f32 %v1034_v47, %v138_v27  ;;  %v523_v56 = vmul.f32 %v395_v48, %v139_v36  ;;  %v268_v57 = vmul.f32 %v140_v49, %v140_v49 }
 0x136   :  { %v1935_v59 = vpop.eup %1934  ;;  %1671 = vst [vmem:[#allocation5 + $0x380] sm:$0xff] %v1543_v50  ;;  %v1417_v60 = vmul.f32 %v1289_v52, %v521_v38  ;;  %v1035_v61 = vadd.f32 48.0, %v907_v53  ;;  %1942 = vrcp.f32 %v140_v49  ;;  %v908_v62 = vmul.f32 -21.0, %v140_v49  ;;  %v145_v38 = vld [vmem:[#allocation2 + $0x3d0] sm:$0xff] }
 0x137   :  { %v1544_v63 = vadd.f32 %v1935_v59, %v1416_v51  ;;  %v1290_v0 = vadd.f32 -28.0, %v1162_v55  ;;  %v396_v1 = vmul.f32 %v268_v57, %v268_v57  ;;  %v269_v2 = vmul.f32 %v141_v58, %v141_v58  ;;  %v146_v51 = vld [vmem:[#allocation2 + $0x3d8] sm:$0xff] }
 0x138   :  { %v1937_v3 = vpop.eup %1936  ;;  %v1163_v4 = vmul.f32 %v1035_v61, %v139_v36  ;;  %v1036_v5 = vadd.f32 48.0, %v908_v62  ;;  %1944 = vrcp.f32 %v141_v58  ;;  %v909_v6 = vmul.f32 -21.0, %v141_v58 }
 0x139   :  { %1672 = vst [vmem:[#allocation5 + $0x388] sm:$0xff] %v1544_v63  ;;  %v1545_v8 = vadd.f32 %v1937_v3, %v1417_v60  ;;  %v1418_v9 = vmul.f32 %v1290_v0, %v522_v54  ;;  %v524_v10 = vmul.f32 %v396_v1, %v140_v49  ;;  %v397_v11 = vmul.f32 %v269_v2, %v269_v2  ;;  %v147_v60 = vld [vmem:[#allocation2 + $0x3e0] sm:$0xff] }
 0x13a   :  { %v1291_v12 = vadd.f32 -28.0, %v1163_v4  ;;  %v1164_v13 = vmul.f32 %v1036_v5, %v140_v49  ;;  %v1037_v14 = vadd.f32 48.0, %v909_v6  ;;  %v270_v15 = vmul.f32 %v142_v7, %v142_v7 }
 0x13b   :  { %v1939_v17 = vpop.eup %1938  ;;  %1673 = vst [vmem:[#allocation5 + $0x390] sm:$0xff] %v1545_v8  ;;  %v525_v18 = vmul.f32 %v397_v11, %v141_v58  ;;  %1946 = vrcp.f32 %v142_v7  ;;  %v910_v19 = vmul.f32 -21.0, %v142_v7  ;;  %v271_v20 = vmul.f32 %v143_v16, %v143_v16 }
 0x13c   :  { %v1546_v21 = vadd.f32 %v1939_v17, %v1418_v9  ;;  %v1419_v22 = vmul.f32 %v1291_v12, %v523_v56  ;;  %v1292_v23 = vadd.f32 -28.0, %v1164_v13  ;;  %v1165_v24 = vmul.f32 %v1037_v14, %v141_v58  ;;  %v148_v9 = vld [vmem:[#allocation2 + $0x3e8] sm:$0xff] }
 0x13d   :  { %v1941_v25 = vpop.eup %1940  ;;  %v398_v26 = vmul.f32 %v270_v15, %v270_v15  ;;  %v1038_v27 = vadd.f32 48.0, %v910_v19  ;;  %v399_v28 = vmul.f32 %v271_v20, %v271_v20  ;;  %1948 = vrcp.f32 %v143_v16 }
 0x13e   :  { %1674 = vst [vmem:[#allocation5 + $0x398] sm:$0xff] %v1546_v21  ;;  %v1547_v30 = vadd.f32 %v1941_v25, %v1419_v22  ;;  %v1420_v31 = vmul.f32 %v1292_v23, %v524_v10  ;;  %v1293_v32 = vadd.f32 -28.0, %v1165_v24  ;;  %v911_v33 = vmul.f32 -21.0, %v143_v16 }
 0x13f   :  { %v526_v34 = vmul.f32 %v398_v26, %v142_v7  ;;  %v1166_v35 = vmul.f32 %v1038_v27, %v142_v7  ;;  %v527_v36 = vmul.f32 %v399_v28, %v143_v16  ;;  %v272_v37 = vmul.f32 %v144_v29, %v144_v29 }
 0x140   :  { %v1943_v39 = vpop.eup %1942  ;;  %1675 = vst [vmem:[#allocation5 + $0x3a0] sm:$0xff] %v1547_v30  ;;  %v1421_v40 = vmul.f32 %v1293_v32, %v525_v18  ;;  %v1039_v41 = vadd.f32 48.0, %v911_v33  ;;  %1950 = vrcp.f32 %v144_v29  ;;  %v912_v42 = vmul.f32 -21.0, %v144_v29  ;;  %v149_v18 = vld [vmem:[#allocation2 + $0x3f0] sm:$0xff] }
 0x141   :  { %v1548_v43 = vadd.f32 %v1943_v39, %v1420_v31  ;;  %v1294_v44 = vadd.f32 -28.0, %v1166_v35  ;;  %v400_v45 = vmul.f32 %v272_v37, %v272_v37  ;;  %v273_v46 = vmul.f32 %v145_v38, %v145_v38  ;;  %v150_v31 = vld [vmem:[#allocation2 + $0x3f8] sm:$0xff] }
 0x142   :  { %v1945_v47 = vpop.eup %1944  ;;  %v1167_v48 = vmul.f32 %v1039_v41, %v143_v16  ;;  %v1040_v49 = vadd.f32 48.0, %v912_v42  ;;  %1952 = vrcp.f32 %v145_v38  ;;  %v913_v50 = vmul.f32 -21.0, %v145_v38 }
 0x143   :  { %1676 = vst [vmem:[#allocation5 + $0x3a8] sm:$0xff] %v1548_v43  ;;  %v1549_v52 = vadd.f32 %v1945_v47, %v1421_v40  ;;  %v1422_v53 = vmul.f32 %v1294_v44, %v526_v34  ;;  %v528_v54 = vmul.f32 %v400_v45, %v144_v29  ;;  %v401_v55 = vmul.f32 %v273_v46, %v273_v46 }
 0x144   :  { %v1295_v56 = vadd.f32 -28.0, %v1167_v48  ;;  %v1168_v57 = vmul.f32 %v1040_v49, %v144_v29  ;;  %v1041_v58 = vadd.f32 48.0, %v913_v50  ;;  %v274_v59 = vmul.f32 %v146_v51, %v146_v51 }
 0x145   :  { %v1947_v61 = vpop.eup %1946  ;;  %1677 = vst [vmem:[#allocation5 + $0x3b0] sm:$0xff] %v1549_v52  ;;  %v529_v62 = vmul.f32 %v401_v55, %v145_v38  ;;  %1954 = vrcp.f32 %v146_v51  ;;  %v914_v63 = vmul.f32 -21.0, %v146_v51  ;;  %v275_v0 = vmul.f32 %v147_v60, %v147_v60 }
 0x146   :  { %v1550_v1 = vadd.f32 %v1947_v61, %v1422_v53  ;;  %v1423_v2 = vmul.f32 %v1295_v56, %v527_v36  ;;  %v1296_v3 = vadd.f32 -28.0, %v1168_v57  ;;  %v1169_v4 = vmul.f32 %v1041_v58, %v145_v38 }
 0x147   :  { %v1949_v5 = vpop.eup %1948  ;;  %v402_v6 = vmul.f32 %v274_v59, %v274_v59  ;;  %v1042_v7 = vadd.f32 48.0, %v914_v63  ;;  %v403_v8 = vmul.f32 %v275_v0, %v275_v0  ;;  %1956 = vrcp.f32 %v147_v60 }
 0x148   :  { %1678 = vst [vmem:[#allocation5 + $0x3b8] sm:$0xff] %v1550_v1  ;;  %v1551_v10 = vadd.f32 %v1949_v5, %v1423_v2  ;;  %v1424_v11 = vmul.f32 %v1296_v3, %v528_v54  ;;  %v1297_v12 = vadd.f32 -28.0, %v1169_v4  ;;  %v915_v13 = vmul.f32 -21.0, %v147_v60 }
 0x149   :  { %v530_v14 = vmul.f32 %v402_v6, %v146_v51  ;;  %v1170_v15 = vmul.f32 %v1042_v7, %v146_v51  ;;  %v531_v16 = vmul.f32 %v403_v8, %v147_v60  ;;  %v276_v17 = vmul.f32 %v148_v9, %v148_v9 }
 0x14a   :  { %v1951_v19 = vpop.eup %1950  ;;  %1679 = vst [vmem:[#allocation5 + $0x3c0] sm:$0xff] %v1551_v10  ;;  %v1425_v20 = vmul.f32 %v1297_v12, %v529_v62  ;;  %v1043_v21 = vadd.f32 48.0, %v915_v13  ;;  %1958 = vrcp.f32 %v148_v9  ;;  %v916_v22 = vmul.f32 -21.0, %v148_v9 }
 0x14b   :  { %v1552_v23 = vadd.f32 %v1951_v19, %v1424_v11  ;;  %v1298_v24 = vadd.f32 -28.0, %v1170_v15  ;;  %v404_v25 = vmul.f32 %v276_v17, %v276_v17  ;;  %v277_v26 = vmul.f32 %v149_v18, %v149_v18 }
 0x14c   :  { %v1953_v27 = vpop.eup %1952  ;;  %v1171_v28 = vmul.f32 %v1043_v21, %v147_v60  ;;  %v1044_v29 = vadd.f32 48.0, %v916_v22  ;;  %1960 = vrcp.f32 %v149_v18  ;;  %v917_v30 = vmul.f32 -21.0, %v149_v18 }
 0x14d   :  { %1680 = vst [vmem:[#allocation5 + $0x3c8] sm:$0xff] %v1552_v23  ;;  %v1553_v32 = vadd.f32 %v1953_v27, %v1425_v20  ;;  %v1426_v33 = vmul.f32 %v1298_v24, %v530_v14  ;;  %v532_v34 = vmul.f32 %v404_v25, %v148_v9  ;;  %v405_v35 = vmul.f32 %v277_v26, %v277_v26 }
 0x14e   :  { %v1299_v36 = vadd.f32 -28.0, %v1171_v28  ;;  %v1172_v37 = vmul.f32 %v1044_v29, %v148_v9  ;;  %v1045_v38 = vadd.f32 48.0, %v917_v30  ;;  %v278_v39 = vmul.f32 %v150_v31, %v150_v31 }
 0x14f   :  { %v1955_v40 = vpop.eup %1954  ;;  %1681 = vst [vmem:[#allocation5 + $0x3d0] sm:$0xff] %v1553_v32  ;;  %v533_v41 = vmul.f32 %v405_v35, %v149_v18  ;;  %1962 = vrcp.f32 %v150_v31  ;;  %v918_v42 = vmul.f32 -21.0, %v150_v31 }
 0x150   :  { %v1554_v43 = vadd.f32 %v1955_v40, %v1426_v33  ;;  %v1427_v44 = vmul.f32 %v1299_v36, %v531_v16  ;;  %v1300_v45 = vadd.f32 -28.0, %v1172_v37  ;;  %v1173_v46 = vmul.f32 %v1045_v38, %v149_v18 }
 0x151   :  { %v1957_v47 = vpop.eup %1956  ;;  %v406_v48 = vmul.f32 %v278_v39, %v278_v39  ;;  %v1046_v49 = vadd.f32 48.0, %v918_v42 }
 0x152   :  { %1682 = vst [vmem:[#allocation5 + $0x3d8] sm:$0xff] %v1554_v43  ;;  %v1555_v50 = vadd.f32 %v1957_v47, %v1427_v44  ;;  %v1428_v51 = vmul.f32 %v1300_v45, %v532_v34  ;;  %v1301_v52 = vadd.f32 -28.0, %v1173_v46 }
 0x153   :  { %v534_v53 = vmul.f32 %v406_v48, %v150_v31  ;;  %v1174_v54 = vmul.f32 %v1046_v49, %v150_v31 }
 0x154   :  { %v1959_v55 = vpop.eup %1958  ;;  %1683 = vst [vmem:[#allocation5 + $0x3e0] sm:$0xff] %v1555_v50  ;;  %v1429_v56 = vmul.f32 %v1301_v52, %v533_v41 }
 0x155   :  { %v1556_v57 = vadd.f32 %v1959_v55, %v1428_v51  ;;  %v1302_v58 = vadd.f32 -28.0, %v1174_v54 }
 0x156   :  { %v1961_v59 = vpop.eup %1960 }
 0x157   :  { %1684 = vst [vmem:[#allocation5 + $0x3e8] sm:$0xff] %v1556_v57  ;;  %v1557_v60 = vadd.f32 %v1961_v59, %v1429_v56  ;;  %v1430_v61 = vmul.f32 %v1302_v58, %v534_v53 }
 0x159   :  { %v1963_v62 = vpop.eup %1962  ;;  %1685 = vst [vmem:[#allocation5 + $0x3f0] sm:$0xff] %v1557_v60 }
 0x15a   :  { %v1558_v63 = vadd.f32 %v1963_v62, %v1430_v61 }
 0x15c   :  { %1686 = vst [vmem:[#allocation5 + $0x3f8] sm:$0xff] %v1558_v63 }
 0x15d   :  { %1997 = shalt.err (!%p1994_p12)
}
 0x15e   :  { %s1998_s24 = scalar_lea.hbm %s2057_s1, 16384 }
 0x15f   :  { %p1999_p13 = scmp.ne.s32.totalorder %s2057_s1, %s1998_s24  ;;  %p2002_p0 = scmp.lt.u32.totalorder %s1998_s24, %s2057_s1 }
 0x161   :  { %p2004_p1 = pnand %p2002_p0, %p1999_p13 }
 0x163   :  { %2007 = shalt.err (!%p2004_p1)
}
 0x164   :  { %1698 = dma.vmem_to_hbm [thread:$0]  %s1693_s20, 16384, %s2057_s1, [#allocation4], %s2013_s16, %s2013_s16, %s2014_s17  }
 0x165   :  { %2010 = dma.done.wait [#allocation4], 16384  }
 0x166   :  { %2011 = vsyncadd [#allocation4], 4294950912 }
 0x167   :  { %1702 = vsyncpa [#allocation3], 1 }
 0x168   :  { %1703 = vsyncpa [#allocation4], 1 }

</bundles_post_ra>
